<compile_context>
chip_gen: v7x
topology: tpu7x:2x2x1
jax: 0.10.0
libtpu: 0.0.40
codegen_flags: <defaults>
</compile_context>

<pallas_src>
import jax
import jax.numpy as jnp
from jax.experimental import pallas as pl
from jax.experimental.pallas import tpu as pltpu


# ----------------------------------------------------------------------------
# Pallas kernels
# ----------------------------------------------------------------------------
def _conv_bn_relu_kernel(p_ref, w_ref, b_ref, o_ref, acc_ref):
    # p: (tm, tk) bf16 im2col patches, w: (tk, tn) bf16 BN-scaled weights,
    # b: (1, tn) f32 folded BN bias, acc: (tm, tn) f32 VMEM accumulator.
    @pl.when(pl.program_id(2) == 0)
    def _init():
        acc_ref[...] = jnp.zeros_like(acc_ref)

    acc_ref[...] += jnp.dot(p_ref[...], w_ref[...],
                            preferred_element_type=jnp.float32)

    @pl.when(pl.program_id(2) == pl.num_programs(2) - 1)
    def _finalize():
        y = acc_ref[...] + b_ref[...]
        o_ref[...] = jnp.maximum(y, 0.0).astype(o_ref.dtype)


def _maxpool_kernel(t_ref, o_ref):
    # t: (KK, tm, Cp) pooling-window taps -> max over the KK taps (VPU).
    o_ref[...] = jnp.max(t_ref[...], axis=0)


# ----------------------------------------------------------------------------
# Tiling helpers
# ----------------------------------------------------------------------------
def _ceil_to(x, m):
    return -(-x // m) * m


def _pick_tile(dim, cap):
    """Pick a tile size (multiple of 128, <= cap) minimizing padded extent."""
    a = _ceil_to(dim, 128)
    if a <= cap:
        return a
    best_t, best_pad = 128, _ceil_to(a, 128)
    for t in range(128, cap + 1, 128):
        padded = _ceil_to(a, t)
        if padded <= best_pad:          # prefer larger tile on ties
            best_t, best_pad = t, padded
    return best_t


# ----------------------------------------------------------------------------
# Wrappers around pallas_call
# ----------------------------------------------------------------------------
def conv_bn_relu_matmul(patches, w_mat, bias):
    """patches: (M, K) bf16, w_mat: (K, N) bf16 (BN-scaled), bias: (N,) f32.

    Returns (M, N) f32 = relu(patches @ w_mat + bias).
    Tiled 3-D grid (M, N, K) with K innermost; f32 accumulator in VMEM scratch.
    """
    M, K = patches.shape
    N = w_mat.shape[1]

    # Tile budget chosen for v7x's 64 MiB VMEM (also fine on v5e/v6e):
    # worst case ~3 MiB of double-buffered blocks + accumulator.
    tm = _pick_tile(M, 256)
    tn = _pick_tile(N, 512)
    tk = _pick_tile(K, 512)
    Mp, Np, Kp = _ceil_to(M, tm), _ceil_to(N, tn), _ceil_to(K, tk)

    # Zero-pad (zeros contribute nothing to the dot product / get sliced away).
    # TODO(synk): stream the 9 conv taps through index_maps instead of
    # materializing padded im2col patches in HBM (next HBM-bandwidth win).
    p = jnp.pad(patches, ((0, Mp - M), (0, Kp - K)))
    wp = jnp.pad(w_mat, ((0, Kp - K), (0, Np - N)))
    bp = jnp.pad(bias.astype(jnp.float32), (0, Np - N)).reshape(1, Np)

    grid = (Mp // tm, Np // tn, Kp // tk)
    cost = pl.CostEstimate(
        flops=2 * Mp * Np * Kp,
        transcendentals=0,
        bytes_accessed=(Mp * Kp + Kp * Np) * 2 + Mp * Np * 4,
    )

    out = pl.pallas_call(
        _conv_bn_relu_kernel,
        out_shape=jax.ShapeDtypeStruct((Mp, Np), jnp.float32),
        grid_spec=pltpu.PrefetchScalarGridSpec(
            num_scalar_prefetch=0,
            grid=grid,
            in_specs=[
                pl.BlockSpec((tm, tk), lambda i, j, k: (i, k)),
                pl.BlockSpec((tk, tn), lambda i, j, k: (k, j)),
                pl.BlockSpec((1, tn), lambda i, j, k: (0, j)),
            ],
            out_specs=pl.BlockSpec((tm, tn), lambda i, j, k: (i, j)),
            scratch_shapes=[pltpu.VMEM((tm, tn), jnp.float32)],
        ),
        compiler_params=pltpu.CompilerParams(
            dimension_semantics=("parallel", "parallel", "arbitrary"),
            vmem_limit_bytes=32 * 1024 * 1024,
        ),
        cost_estimate=cost,
    )(p, wp, bp)
    return out[:M, :N]


def maxpool_reduce(taps):
    """taps: (KK, M, C) f32 -> (M, C) elementwise max over axis 0, tiled over M."""
    KK, M, C = taps.shape
    Cp = _ceil_to(C, 128)
    tm = min(512, _ceil_to(M, 8))
    Mp = _ceil_to(M, tm)
    # Zero padding is safe: padded rows/cols are sliced away below.
    p = jnp.pad(taps, ((0, 0), (0, Mp - M), (0, Cp - C)))

    cost = pl.CostEstimate(
        flops=KK * Mp * Cp,
        transcendentals=0,
        bytes_accessed=KK * Mp * Cp * 4 + Mp * Cp * 4,
    )
    out = pl.pallas_call(
        _maxpool_kernel,
        out_shape=jax.ShapeDtypeStruct((Mp, Cp), taps.dtype),
        grid=(Mp // tm,),
        in_specs=[pl.BlockSpec((KK, tm, Cp), lambda i: (0, i, 0))],
        out_specs=pl.BlockSpec((tm, Cp), lambda i: (i, 0)),
        compiler_params=pltpu.CompilerParams(
            dimension_semantics=("parallel",),
            vmem_limit_bytes=32 * 1024 * 1024,
        ),
        cost_estimate=cost,
    )(p)
    return out[:M, :C]


# ----------------------------------------------------------------------------
# Glue: im2col, BN folding, BasicConv2d, InceptionB
# ----------------------------------------------------------------------------
def _im2col(x_nhwc, ksize, stride, padding):
    """Returns patches (N*Ho*Wo, ksize*ksize*C) with (ky, kx, c) K-ordering."""
    n, h, w, c = x_nhwc.shape
    if padding:
        x_nhwc = jnp.pad(
            x_nhwc, ((0, 0), (padding, padding), (padding, padding), (0, 0)))
        h += 2 * padding
        w += 2 * padding
    ho = (h - ksize) // stride + 1
    wo = (w - ksize) // stride + 1
    cols = []
    for ky in range(ksize):
        for kx in range(ksize):
            sl = jax.lax.slice(
                x_nhwc,
                (0, ky, kx, 0),
                (n, ky + (ho - 1) * stride + 1, kx + (wo - 1) * stride + 1, c),
                (1, stride, stride, 1))
            cols.append(sl.reshape(n * ho * wo, c))
    return jnp.concatenate(cols, axis=1), ho, wo


def _fold_bn(gamma, beta, running_mean, running_var, eps=0.001):
    scale = gamma / jnp.sqrt(running_var + eps)
    bias = beta - running_mean * scale
    return scale, bias


def basic_conv2d(x_nhwc, params, ksize, stride, padding, use_pallas=True):
    """BasicConv2d forward: conv(bias=False) -> BN(eps=1e-3, inference) -> ReLU."""
    n = x_nhwc.shape[0]
    w = params["w"]                       # (out, in, kh, kw)  PyTorch layout
    out_c = w.shape[0]
    scale, bias = _fold_bn(params["gamma"], params["beta"],
                           params["mean"], params["var"])
    # Fold BN scale into the conv weights once (removes per-element mul and one
    # broadcast operand from the kernel epilogue); bf16 operands, f32 accum.
    w_mat = (jnp.transpose(w, (2, 3, 1, 0)).reshape(-1, out_c)
             * scale[None, :]).astype(jnp.bfloat16)

    patches, ho, wo = _im2col(x_nhwc.astype(jnp.bfloat16), ksize, stride, padding)

    if use_pallas:
        y = conv_bn_relu_matmul(patches, w_mat, bias)
    else:
        # Tiny GEMM (e.g. the 1x1 / 64-channel conv): padded Pallas tiles would
        # waste MXU lanes and emit masked stores; let XLA handle it.
        y = jnp.maximum(
            jnp.dot(patches, w_mat, preferred_element_type=jnp.float32) + bias,
            0.0)
    return y.reshape(n, ho, wo, out_c)


def max_pool2d_3x3_s2(x_nhwc):
    """3x3/stride-2 VALID max-pool via 9 strided-slice taps + Pallas max kernel."""
    n, h, w, c = x_nhwc.shape
    ho = (h - 3) // 2 + 1
    wo = (w - 3) // 2 + 1
    m = n * ho * wo
    taps = []
    for ky in range(3):
        for kx in range(3):
            sl = jax.lax.slice(
                x_nhwc,
                (0, ky, kx, 0),
                (n, ky + (ho - 1) * 2 + 1, kx + (wo - 1) * 2 + 1, c),
                (1, 2, 2, 1))
            taps.append(sl.reshape(m, c))
    taps = jnp.stack(taps, axis=0)              # (9, M, C), no transpose needed
    y = maxpool_reduce(taps)
    return y.reshape(n, ho, wo, c)


def init_basic_conv(key, in_c, out_c, ksize):
    k1, k2, k3, k4, k5 = jax.random.split(key, 5)
    return {
        "w": 0.1 * jax.random.normal(k1, (out_c, in_c, ksize, ksize), jnp.float32),
        "gamma": 1.0 + 0.1 * jax.random.normal(k2, (out_c,), jnp.float32),
        "beta": 0.1 * jax.random.normal(k3, (out_c,), jnp.float32),
        "mean": 0.1 * jax.random.normal(k4, (out_c,), jnp.float32),
        "var": jax.random.uniform(k5, (out_c,), jnp.float32, 0.5, 1.5),
    }


def init_inception_b(key, in_channels):
    k1, k2, k3, k4 = jax.random.split(key, 4)
    return {
        "branch3x3": init_basic_conv(k1, in_channels, 384, 3),
        "branch3x3dbl_1": init_basic_conv(k2, in_channels, 64, 1),
        "branch3x3dbl_2": init_basic_conv(k3, 64, 96, 3),
        "branch3x3dbl_3": init_basic_conv(k4, 96, 96, 3),
    }


def inception_b_forward(params, x_nchw):
    """x_nchw: (N, C, H, W) -> (N, 384+96+C, Ho, Wo), matching torch.cat(dim=1)."""
    x = jnp.transpose(x_nchw, (0, 2, 3, 1))  # NCHW -> NHWC

    b3 = basic_conv2d(x, params["branch3x3"], ksize=3, stride=2, padding=0)

    bd = basic_conv2d(x, params["branch3x3dbl_1"], ksize=1, stride=1, padding=0,
                      use_pallas=False)       # tiny 1x1 GEMM -> XLA (perf review)
    bd = basic_conv2d(bd, params["branch3x3dbl_2"], ksize=3, stride=1, padding=1)
    bd = basic_conv2d(bd, params["branch3x3dbl_3"], ksize=3, stride=2, padding=0)

    bp = max_pool2d_3x3_s2(x)

    out = jnp.concatenate([b3, bd, bp], axis=-1)   # channel-last concat
    return jnp.transpose(out, (0, 3, 1, 2))        # back to NCHW


def _ref_forward(params, x_nchw):
    """Pure-XLA reference using the same bf16 quantization (for validation)."""
    x = jnp.transpose(x_nchw, (0, 2, 3, 1))
    b3 = basic_conv2d(x, params["branch3x3"], 3, 2, 0, use_pallas=False)
    bd = basic_conv2d(x, params["branch3x3dbl_1"], 1, 1, 0, use_pallas=False)
    bd = basic_conv2d(bd, params["branch3x3dbl_2"], 3, 1, 1, use_pallas=False)
    bd = basic_conv2d(bd, params["branch3x3dbl_3"], 3, 2, 0, use_pallas=False)
    bp = jax.lax.reduce_window(x, -jnp.inf, jax.lax.max,
                               (1, 3, 3, 1), (1, 2, 2, 1), "VALID")
    out = jnp.concatenate([b3, bd, bp], axis=-1)
    return jnp.transpose(out, (0, 3, 1, 2))


if __name__ == "__main__":
    key = jax.random.PRNGKey(0)
    kx, kp = jax.random.split(key)

    batch, in_channels, spatial = 2, 4, 16
    x = jax.random.normal(kx, (batch, in_channels, spatial, spatial), jnp.float32)
    params = init_inception_b(kp, in_channels)

    fwd = jax.jit(inception_b_forward)
    out = jax.block_until_ready(fwd(params, x))

    expected = (batch, 384 + 96 + in_channels, 7, 7)
    assert out.shape == expected, (out.shape, expected)
    assert bool(jnp.all(jnp.isfinite(out)))

    ref = jax.block_until_ready(_ref_forward(params, x))
    max_err = float(jnp.max(jnp.abs(out - ref)))
    assert jnp.allclose(out, ref, rtol=3e-2, atol=3e-2), max_err

    print("KERNEL_OK")
</pallas_src>

<mosaic_0001>
module attributes {stable_mosaic.version = 11 : i64} {
  func.func @_conv_bn_relu_kernel(%arg0: i32, %arg1: i32, %arg2: i32, %arg3: memref<256x128xbf16, #tpu.memory_space<vmem>>, %arg4: memref<128x128xbf16, #tpu.memory_space<vmem>>, %arg5: memref<1x128xf32, #tpu.memory_space<vmem>>, %arg6: memref<256x128xf32, #tpu.memory_space<vmem>>, %arg7: memref<256x128xf32, #tpu.memory_space<vmem>>) attributes {dimension_semantics = [#tpu.dimension_semantics<parallel>, #tpu.dimension_semantics<parallel>, #tpu.dimension_semantics<arbitrary>], iteration_bounds = array<i64: 2, 1, 5>, scalar_prefetch = 0 : i64, scratch_operands = 1 : i64, tpu.core_type = #tpu.core_type<tc>, window_params = [{transform_indices = @transform_0, window_bounds = array<i64: 256, 128>}, {transform_indices = @transform_1, window_bounds = array<i64: 128, 128>}, {transform_indices = @transform_2, window_bounds = array<i64: 1, 128>}, {transform_indices = @transform_3, window_bounds = array<i64: 256, 128>}]} {
    %c0_i32 = arith.constant 0 : i32
    %0 = arith.cmpi eq, %arg2, %c0_i32 : i32
    %1 = arith.extui %0 : i1 to i32
    %c0_i32_0 = arith.constant 0 : i32
    %2 = arith.cmpi ne, %1, %c0_i32_0 : i32
    scf.if %2 {
      %cst_9 = arith.constant 0.000000e+00 : f32
      %12 = vector.broadcast %cst_9 : f32 to vector<256x128xf32>
      %c0_10 = arith.constant 0 : index
      %c0_11 = arith.constant 0 : index
      %13 = vector.load %arg7[%c0_10, %c0_11] : memref<256x128xf32, #tpu.memory_space<vmem>>, vector<256x128xf32>
      tpu.vector_store %arg7[%c0_10, %c0_11], %12 {strides = array<i32>} : memref<256x128xf32, #tpu.memory_space<vmem>>, vector<256x128xf32>,
    } else {
    }
    %c0 = arith.constant 0 : index
    %c0_1 = arith.constant 0 : index
    %3 = vector.load %arg7[%c0, %c0_1] : memref<256x128xf32, #tpu.memory_space<vmem>>, vector<256x128xf32>
    %c0_2 = arith.constant 0 : index
    %c0_3 = arith.constant 0 : index
    %4 = vector.load %arg3[%c0_2, %c0_3] : memref<256x128xbf16, #tpu.memory_space<vmem>>, vector<256x128xbf16>
    %c0_4 = arith.constant 0 : index
    %c0_5 = arith.constant 0 : index
    %5 = vector.load %arg4[%c0_4, %c0_5] : memref<128x128xbf16, #tpu.memory_space<vmem>>, vector<128x128xbf16>
    %cst = arith.constant dense<0.000000e+00> : vector<256x128xf32>
    %6 = tpu.matmul %4, %5, %cst {dimension_numbers = #tpu.dot_dimension_numbers<[1], [0], [0], [1], [0, 0, 1, 1], [], []>} : vector<256x128xbf16>, vector<128x128xbf16>, vector<256x128xf32> -> vector<256x128xf32>
    %7 = arith.addf %3, %6 : vector<256x128xf32>
    %c0_6 = arith.constant 0 : index
    %c0_7 = arith.constant 0 : index
    %8 = vector.load %arg7[%c0_6, %c0_7] : memref<256x128xf32, #tpu.memory_space<vmem>>, vector<256x128xf32>
    tpu.vector_store %arg7[%c0_6, %c0_7], %7 {strides = array<i32>} : memref<256x128xf32, #tpu.memory_space<vmem>>, vector<256x128xf32>,
    %c4_i32 = arith.constant 4 : i32
    %9 = arith.cmpi eq, %arg2, %c4_i32 : i32
    %10 = arith.extui %9 : i1 to i32
    %c0_i32_8 = arith.constant 0 : i32
    %11 = arith.cmpi ne, %10, %c0_i32_8 : i32
    scf.if %11 {
      %c0_9 = arith.constant 0 : index
      %c0_10 = arith.constant 0 : index
      %12 = vector.load %arg7[%c0_9, %c0_10] : memref<256x128xf32, #tpu.memory_space<vmem>>, vector<256x128xf32>
      %c0_11 = arith.constant 0 : index
      %c0_12 = arith.constant 0 : index
      %13 = vector.load %arg5[%c0_11, %c0_12] : memref<1x128xf32, #tpu.memory_space<vmem>>, vector<1x128xf32>
      %14 = vector.broadcast %13 : vector<1x128xf32> to vector<256x128xf32>
      %15 = arith.addf %12, %14 : vector<256x128xf32>
      %cst_13 = arith.constant 0.000000e+00 : f32
      %16 = vector.broadcast %cst_13 : f32 to vector<256x128xf32>
      %17 = arith.maximumf %15, %16 : vector<256x128xf32>
      %c0_14 = arith.constant 0 : index
      %c0_15 = arith.constant 0 : index
      %18 = vector.load %arg6[%c0_14, %c0_15] : memref<256x128xf32, #tpu.memory_space<vmem>>, vector<256x128xf32>
      tpu.vector_store %arg6[%c0_14, %c0_15], %17 {strides = array<i32>} : memref<256x128xf32, #tpu.memory_space<vmem>>, vector<256x128xf32>,
    } else {
    }
    return
  }
  func.func @transform_0(%arg0: i32, %arg1: i32, %arg2: i32) -> (i32, i32) {
    %c0_i32 = arith.constant 0 : i32
    return %arg0, %arg2 : i32, i32
  }
  func.func @transform_1(%arg0: i32, %arg1: i32, %arg2: i32) -> (i32, i32) {
    %c0_i32 = arith.constant 0 : i32
    return %arg2, %arg1 : i32, i32
  }
  func.func @transform_2(%arg0: i32, %arg1: i32, %arg2: i32) -> (i32, i32) {
    %c0_i32 = arith.constant 0 : i32
    %c0_i32_0 = arith.constant 0 : i32
    return %c0_i32, %arg1 : i32, i32
  }
  func.func @transform_3(%arg0: i32, %arg1: i32, %arg2: i32) -> (i32, i32) {
    %c0_i32 = arith.constant 0 : i32
    return %arg0, %arg1 : i32, i32
  }
}

module attributes {stable_mosaic.version = 11 : i64} {
  func.func @_conv_bn_relu_kernel(%arg0: i32, %arg1: i32, %arg2: i32, %arg3: memref<128x128xbf16, #tpu.memory_space<vmem>>, %arg4: memref<128x128xbf16, #tpu.memory_space<vmem>>, %arg5: memref<1x128xf32, #tpu.memory_space<vmem>>, %arg6: memref<128x128xf32, #tpu.memory_space<vmem>>, %arg7: memref<128x128xf32, #tpu.memory_space<vmem>>) attributes {dimension_semantics = [#tpu.dimension_semantics<parallel>, #tpu.dimension_semantics<parallel>, #tpu.dimension_semantics<arbitrary>], iteration_bounds = array<i64: 1, 1, 7>, scalar_prefetch = 0 : i64, scratch_operands = 1 : i64, tpu.core_type = #tpu.core_type<tc>, window_params = [{transform_indices = @transform_0, window_bounds = array<i64: 128, 128>}, {transform_indices = @transform_1, window_bounds = array<i64: 128, 128>}, {transform_indices = @transform_2, window_bounds = array<i64: 1, 128>}, {transform_indices = @transform_3, window_bounds = array<i64: 128, 128>}]} {
    %c0_i32 = arith.constant 0 : i32
    %0 = arith.cmpi eq, %arg2, %c0_i32 : i32
    %1 = arith.extui %0 : i1 to i32
    %c0_i32_0 = arith.constant 0 : i32
    %2 = arith.cmpi ne, %1, %c0_i32_0 : i32
    scf.if %2 {
      %cst_9 = arith.constant 0.000000e+00 : f32
      %12 = vector.broadcast %cst_9 : f32 to vector<128x128xf32>
      %c0_10 = arith.constant 0 : index
      %c0_11 = arith.constant 0 : index
      %13 = vector.load %arg7[%c0_10, %c0_11] : memref<128x128xf32, #tpu.memory_space<vmem>>, vector<128x128xf32>
      tpu.vector_store %arg7[%c0_10, %c0_11], %12 {strides = array<i32>} : memref<128x128xf32, #tpu.memory_space<vmem>>, vector<128x128xf32>,
    } else {
    }
    %c0 = arith.constant 0 : index
    %c0_1 = arith.constant 0 : index
    %3 = vector.load %arg7[%c0, %c0_1] : memref<128x128xf32, #tpu.memory_space<vmem>>, vector<128x128xf32>
    %c0_2 = arith.constant 0 : index
    %c0_3 = arith.constant 0 : index
    %4 = vector.load %arg3[%c0_2, %c0_3] : memref<128x128xbf16, #tpu.memory_space<vmem>>, vector<128x128xbf16>
    %c0_4 = arith.constant 0 : index
    %c0_5 = arith.constant 0 : index
    %5 = vector.load %arg4[%c0_4, %c0_5] : memref<128x128xbf16, #tpu.memory_space<vmem>>, vector<128x128xbf16>
    %cst = arith.constant dense<0.000000e+00> : vector<128x128xf32>
    %6 = tpu.matmul %4, %5, %cst {dimension_numbers = #tpu.dot_dimension_numbers<[1], [0], [0], [1], [0, 0, 1, 1], [], []>} : vector<128x128xbf16>, vector<128x128xbf16>, vector<128x128xf32> -> vector<128x128xf32>
    %7 = arith.addf %3, %6 : vector<128x128xf32>
    %c0_6 = arith.constant 0 : index
    %c0_7 = arith.constant 0 : index
    %8 = vector.load %arg7[%c0_6, %c0_7] : memref<128x128xf32, #tpu.memory_space<vmem>>, vector<128x128xf32>
    tpu.vector_store %arg7[%c0_6, %c0_7], %7 {strides = array<i32>} : memref<128x128xf32, #tpu.memory_space<vmem>>, vector<128x128xf32>,
    %c6_i32 = arith.constant 6 : i32
    %9 = arith.cmpi eq, %arg2, %c6_i32 : i32
    %10 = arith.extui %9 : i1 to i32
    %c0_i32_8 = arith.constant 0 : i32
    %11 = arith.cmpi ne, %10, %c0_i32_8 : i32
    scf.if %11 {
      %c0_9 = arith.constant 0 : index
      %c0_10 = arith.constant 0 : index
      %12 = vector.load %arg7[%c0_9, %c0_10] : memref<128x128xf32, #tpu.memory_space<vmem>>, vector<128x128xf32>
      %c0_11 = arith.constant 0 : index
      %c0_12 = arith.constant 0 : index
      %13 = vector.load %arg5[%c0_11, %c0_12] : memref<1x128xf32, #tpu.memory_space<vmem>>, vector<1x128xf32>
      %14 = vector.broadcast %13 : vector<1x128xf32> to vector<128x128xf32>
      %15 = arith.addf %12, %14 : vector<128x128xf32>
      %cst_13 = arith.constant 0.000000e+00 : f32
      %16 = vector.broadcast %cst_13 : f32 to vector<128x128xf32>
      %17 = arith.maximumf %15, %16 : vector<128x128xf32>
      %c0_14 = arith.constant 0 : index
      %c0_15 = arith.constant 0 : index
      %18 = vector.load %arg6[%c0_14, %c0_15] : memref<128x128xf32, #tpu.memory_space<vmem>>, vector<128x128xf32>
      tpu.vector_store %arg6[%c0_14, %c0_15], %17 {strides = array<i32>} : memref<128x128xf32, #tpu.memory_space<vmem>>, vector<128x128xf32>,
    } else {
    }
    return
  }
  func.func @transform_0(%arg0: i32, %arg1: i32, %arg2: i32) -> (i32, i32) {
    %c0_i32 = arith.constant 0 : i32
    return %arg0, %arg2 : i32, i32
  }
  func.func @transform_1(%arg0: i32, %arg1: i32, %arg2: i32) -> (i32, i32) {
    %c0_i32 = arith.constant 0 : i32
    return %arg2, %arg1 : i32, i32
  }
  func.func @transform_2(%arg0: i32, %arg1: i32, %arg2: i32) -> (i32, i32) {
    %c0_i32 = arith.constant 0 : i32
    %c0_i32_0 = arith.constant 0 : i32
    return %c0_i32, %arg1 : i32, i32
  }
  func.func @transform_3(%arg0: i32, %arg1: i32, %arg2: i32) -> (i32, i32) {
    %c0_i32 = arith.constant 0 : i32
    return %arg0, %arg1 : i32, i32
  }
}

module attributes {stable_mosaic.version = 11 : i64} {
  func.func @_conv_bn_relu_kernel(%arg0: i32, %arg1: i32, %arg2: i32, %arg3: memref<128x128xbf16, #tpu.memory_space<vmem>>, %arg4: memref<128x384xbf16, #tpu.memory_space<vmem>>, %arg5: memref<1x384xf32, #tpu.memory_space<vmem>>, %arg6: memref<128x384xf32, #tpu.memory_space<vmem>>, %arg7: memref<128x384xf32, #tpu.memory_space<vmem>>) attributes {dimension_semantics = [#tpu.dimension_semantics<parallel>, #tpu.dimension_semantics<parallel>, #tpu.dimension_semantics<arbitrary>], iteration_bounds = array<i64: 1, 1, 1>, scalar_prefetch = 0 : i64, scratch_operands = 1 : i64, tpu.core_type = #tpu.core_type<tc>, window_params = [{transform_indices = @transform_0, window_bounds = array<i64: 128, 128>}, {transform_indices = @transform_1, window_bounds = array<i64: 128, 384>}, {transform_indices = @transform_2, window_bounds = array<i64: 1, 384>}, {transform_indices = @transform_3, window_bounds = array<i64: 128, 384>}]} {
    %c0_i32 = arith.constant 0 : i32
    %0 = arith.cmpi eq, %arg2, %c0_i32 : i32
    %1 = arith.extui %0 : i1 to i32
    %c0_i32_0 = arith.constant 0 : i32
    %2 = arith.cmpi ne, %1, %c0_i32_0 : i32
    scf.if %2 {
      %cst_10 = arith.constant 0.000000e+00 : f32
      %12 = vector.broadcast %cst_10 : f32 to vector<128x384xf32>
      %c0_11 = arith.constant 0 : index
      %c0_12 = arith.constant 0 : index
      %13 = vector.load %arg7[%c0_11, %c0_12] : memref<128x384xf32, #tpu.memory_space<vmem>>, vector<128x384xf32>
      tpu.vector_store %arg7[%c0_11, %c0_12], %12 {strides = array<i32>} : memref<128x384xf32, #tpu.memory_space<vmem>>, vector<128x384xf32>,
    } else {
    }
    %c0 = arith.constant 0 : index
    %c0_1 = arith.constant 0 : index
    %3 = vector.load %arg7[%c0, %c0_1] : memref<128x384xf32, #tpu.memory_space<vmem>>, vector<128x384xf32>
    %c0_2 = arith.constant 0 : index
    %c0_3 = arith.constant 0 : index
    %4 = vector.load %arg3[%c0_2, %c0_3] : memref<128x128xbf16, #tpu.memory_space<vmem>>, vector<128x128xbf16>
    %c0_4 = arith.constant 0 : index
    %c0_5 = arith.constant 0 : index
    %5 = vector.load %arg4[%c0_4, %c0_5] : memref<128x384xbf16, #tpu.memory_space<vmem>>, vector<128x384xbf16>
    %cst = arith.constant dense<0.000000e+00> : vector<128x384xf32>
    %6 = tpu.matmul %4, %5, %cst {dimension_numbers = #tpu.dot_dimension_numbers<[1], [0], [0], [1], [0, 0, 1, 1], [], []>} : vector<128x128xbf16>, vector<128x384xbf16>, vector<128x384xf32> -> vector<128x384xf32>
    %7 = arith.addf %3, %6 : vector<128x384xf32>
    %c0_6 = arith.constant 0 : index
    %c0_7 = arith.constant 0 : index
    %8 = vector.load %arg7[%c0_6, %c0_7] : memref<128x384xf32, #tpu.memory_space<vmem>>, vector<128x384xf32>
    tpu.vector_store %arg7[%c0_6, %c0_7], %7 {strides = array<i32>} : memref<128x384xf32, #tpu.memory_space<vmem>>, vector<128x384xf32>,
    %c0_i32_8 = arith.constant 0 : i32
    %9 = arith.cmpi eq, %arg2, %c0_i32_8 : i32
    %10 = arith.extui %9 : i1 to i32
    %c0_i32_9 = arith.constant 0 : i32
    %11 = arith.cmpi ne, %10, %c0_i32_9 : i32
    scf.if %11 {
      %c0_10 = arith.constant 0 : index
      %c0_11 = arith.constant 0 : index
      %12 = vector.load %arg7[%c0_10, %c0_11] : memref<128x384xf32, #tpu.memory_space<vmem>>, vector<128x384xf32>
      %c0_12 = arith.constant 0 : index
      %c0_13 = arith.constant 0 : index
      %13 = vector.load %arg5[%c0_12, %c0_13] : memref<1x384xf32, #tpu.memory_space<vmem>>, vector<1x384xf32>
      %14 = vector.broadcast %13 : vector<1x384xf32> to vector<128x384xf32>
      %15 = arith.addf %12, %14 : vector<128x384xf32>
      %cst_14 = arith.constant 0.000000e+00 : f32
      %16 = vector.broadcast %cst_14 : f32 to vector<128x384xf32>
      %17 = arith.maximumf %15, %16 : vector<128x384xf32>
      %c0_15 = arith.constant 0 : index
      %c0_16 = arith.constant 0 : index
      %18 = vector.load %arg6[%c0_15, %c0_16] : memref<128x384xf32, #tpu.memory_space<vmem>>, vector<128x384xf32>
      tpu.vector_store %arg6[%c0_15, %c0_16], %17 {strides = array<i32>} : memref<128x384xf32, #tpu.memory_space<vmem>>, vector<128x384xf32>,
    } else {
    }
    return
  }
  func.func @transform_0(%arg0: i32, %arg1: i32, %arg2: i32) -> (i32, i32) {
    %c0_i32 = arith.constant 0 : i32
    return %arg0, %arg2 : i32, i32
  }
  func.func @transform_1(%arg0: i32, %arg1: i32, %arg2: i32) -> (i32, i32) {
    %c0_i32 = arith.constant 0 : i32
    return %arg2, %arg1 : i32, i32
  }
  func.func @transform_2(%arg0: i32, %arg1: i32, %arg2: i32) -> (i32, i32) {
    %c0_i32 = arith.constant 0 : i32
    %c0_i32_0 = arith.constant 0 : i32
    return %c0_i32, %arg1 : i32, i32
  }
  func.func @transform_3(%arg0: i32, %arg1: i32, %arg2: i32) -> (i32, i32) {
    %c0_i32 = arith.constant 0 : i32
    return %arg0, %arg1 : i32, i32
  }
}

module attributes {stable_mosaic.version = 11 : i64} {
  func.func @_maxpool_kernel(%arg0: i32, %arg1: memref<9x104x128xf32, #tpu.memory_space<vmem>>, %arg2: memref<104x128xf32, #tpu.memory_space<vmem>>) attributes {dimension_semantics = [#tpu.dimension_semantics<parallel>], iteration_bounds = array<i64: 1>, scalar_prefetch = 0 : i64, scratch_operands = 0 : i64, tpu.core_type = #tpu.core_type<tc>, window_params = [{transform_indices = @transform_0, window_bounds = array<i64: 9, 104, 128>}, {transform_indices = @transform_1, window_bounds = array<i64: 104, 128>}]} {
    %c0 = arith.constant 0 : index
    %c0_0 = arith.constant 0 : index
    %c0_1 = arith.constant 0 : index
    %0 = vector.load %arg1[%c0, %c0_0, %c0_1] : memref<9x104x128xf32, #tpu.memory_space<vmem>>, vector<9x104x128xf32>
    %cst = arith.constant dense<0xFF800000> : vector<104x128xf32>
    %1 = vector.multi_reduction <maximumf>, %0, %cst [0] : vector<9x104x128xf32> to vector<104x128xf32>
    %c0_2 = arith.constant 0 : index
    %c0_3 = arith.constant 0 : index
    %2 = vector.load %arg2[%c0_2, %c0_3] : memref<104x128xf32, #tpu.memory_space<vmem>>, vector<104x128xf32>
    tpu.vector_store %arg2[%c0_2, %c0_3], %1 {strides = array<i32>} : memref<104x128xf32, #tpu.memory_space<vmem>>, vector<104x128xf32>,
    return
  }
  func.func @transform_0(%arg0: i32) -> (i32, i32, i32) {
    %c0_i32 = arith.constant 0 : i32
    %c0_i32_0 = arith.constant 0 : i32
    %c0_i32_1 = arith.constant 0 : i32
    return %c0_i32, %arg0, %c0_i32_0 : i32, i32, i32
  }
  func.func @transform_1(%arg0: i32) -> (i32, i32) {
    %c0_i32 = arith.constant 0 : i32
    %c0_i32_0 = arith.constant 0 : i32
    return %arg0, %c0_i32 : i32, i32
  }
}

</mosaic_0001>

<bundles_post_ra>
// kernel: inception_b_forward.5
= control target key start
LH: loop header
LB: loop body
LE: loop exit
PB: predicated region body
PF: predicated region fallthrough
CT: control target
= control target key end

     0   :  { %s1449_s12 = smov 0   ;;  %s1451_s13 = smov 0   ;;  %s1710_s0 = inlined_call_operand.vmem [shape: bf16[512,640], index: 0, kind: input, shape index: {}]   ;;  %s1711_s1 = inlined_call_operand.vmem [shape: bf16[640,128], index: 1, kind: input, shape index: {}]   ;;  %s1712_s2 = inlined_call_operand.vmem [shape: f32[1,128], index: 2, kind: input, shape index: {}]   ;;  %s1713_s3 = inlined_call_operand.vmem [shape: f32[512,128], index: 3, kind: output, shape index: {}]  }
   0x1   :  { %s1453_s14 = smov 0   ;;  %s1455_s15 = smov 0  }
   0x2   :  { %s1457_s16 = smov 0   ;;  %s1459_s17 = smov 0  }
   0x3   :  { %s1461_s18 = smov 0  }
   0x4 LB: > { %s25_s19 = sadd.s32 1, %s1418_s16  ;;  %s32_s20 = sadd.s32 1, %s1422_s17  ;;  %s1426_s18 = sphi %s1461_s18, %s13_s18   ;;  %s1422_s17 = sphi %s1459_s17, %s1719_s17   ;;  %s1418_s16 = sphi %s1457_s16, %s1718_s16   ;;  %s1414_s15 = sphi %s1455_s15, %s1717_s15   ;;  %s1410_s14 = sphi %s1453_s14, %s1716_s14   ;;  %s1406_s13 = sphi %s1451_s13, %s1715_s13   ;;  %s1402_s12 = sphi %s1449_s12, %s1714_s12  }
   0x5   : > { %p26_p0 = scmp.ge.s32.totalorder %s25_s19, 5  ;;  %p48_p1 = scmp.ne.s32.totalorder %s1406_s13, %s1402_s12 }
   0x6   : > { %p49_p2 = scmp.eq.s32.totalorder %s1426_s18, 0  ;;  %s41_s24 = sadd.s32 1, %s1406_s13 }
   0x7   : > { %s1721_s19 = smov (%p26_p0, %s25_s19), 0  ;;  %s1723_s20 = smov (!%p26_p0, %s32_s20), %s1422_s17 }
   0x8   : > { %p50_p3 = por %p49_p2, %p48_p1  ;;  %p34_p4 = scmp.ge.s32.totalorder %s1723_s20, 2 }
   0x9   : > { %s37_s21 = ssub.s32 %s1418_s16, %s1721_s19  ;;  %p1162_p6 = scmp.ge.s32.totalorder %s1426_s18, 10 }
   0xa   : > { %s1725_s20 = smov (%p34_p4, %s1723_s20), 0 }
   0xb   : > { %s36_s22 = ssub.s32 %s1422_s17, %s1725_s20  ;;  %162 = sbr.rel (%p1162_p6) target bundleno = 46 (0x2e), region = 20 }
   0xc   : > { %s38_s23 = sor.u32 %s37_s21, %s36_s22 }
   0xd   : > { %p39_p5 = scmp.eq.s32.totalorder %s38_s23, 0 }
   0xf   : > { %s1500_s25 = scalar_select %p39_p5, %s1406_s13, %s41_s24  }
  0x12   : > { %165 = sbr.rel (!%p50_p3) target bundleno = 46 (0x2e), region = 24  ;;  %s167_s26 = sand.u32 (%p50_p3), 1, %s1406_s13  }
  0x13   : > { %s1290_s27 = smul.u32 (%p50_p3), 160, %s1422_s17  ;;  %s1163_s28 = sshll.u32 (%p50_p3), %s167_s26, 7 }
  0x14   : > { %s1514_s7 = scalar_lea.vmem (%p50_p3), [#allocation3], %s1163_s28 }
  0x15   : > { %s172_s29 = sadd.s32 (%p50_p3), %s1418_s16, %s1290_s27 }
  0x16   : > { %s1166_s30 = sshll.u32 (%p50_p3), %s172_s29, 2 }
  0x17   : > { %s1509_s6 = scalar_lea.vmem (%p50_p3), %s1710_s0, %s1166_s30 }
  0x18   : > { %v190_v0 = vld [vmem:[%s1509_s6] sm:$0xf] (%p50_p3)  ;;  %v192_v1 = vld [vmem:[%s1509_s6 + $0x14] sm:$0xf] (%p50_p3)  ;;  %v194_v2 = vld [vmem:[%s1509_s6 + $0x28] sm:$0xf] (%p50_p3) }
  0x19   : > { %191 = vst [vmem:[%s1514_s7] sm:$0xf] %v190_v0  ;;  %193 = vst [vmem:[%s1514_s7 + $0x4] sm:$0xf] %v192_v1  ;;  %v196_v3 = vld [vmem:[%s1509_s6 + $0x3c] sm:$0xf] }
  0x1a   : > { %195 = vst [vmem:[%s1514_s7 + $0x8] sm:$0xf] %v194_v2  ;;  %v198_v4 = vld [vmem:[%s1509_s6 + $0x50] sm:$0xf]  ;;  %v200_v5 = vld [vmem:[%s1509_s6 + $0x64] sm:$0xf] }
  0x1b   : > { %197 = vst [vmem:[%s1514_s7 + $0xc] sm:$0xf] %v196_v3  ;;  %199 = vst [vmem:[%s1514_s7 + $0x10] sm:$0xf] %v198_v4  ;;  %v202_v6 = vld [vmem:[%s1509_s6 + $0x78] sm:$0xf] }
  0x1c   : > { %201 = vst [vmem:[%s1514_s7 + $0x14] sm:$0xf] %v200_v5  ;;  %v204_v7 = vld [vmem:[%s1509_s6 + $0x8c] sm:$0xf]  ;;  %v206_v8 = vld [vmem:[%s1509_s6 + $0xa0] sm:$0xf] }
  0x1d   : > { %203 = vst [vmem:[%s1514_s7 + $0x18] sm:$0xf] %v202_v6  ;;  %205 = vst [vmem:[%s1514_s7 + $0x1c] sm:$0xf] %v204_v7  ;;  %v208_v9 = vld [vmem:[%s1509_s6 + $0xb4] sm:$0xf] }
  0x1e   : > { %207 = vst [vmem:[%s1514_s7 + $0x20] sm:$0xf] %v206_v8  ;;  %v210_v10 = vld [vmem:[%s1509_s6 + $0xc8] sm:$0xf]  ;;  %v212_v11 = vld [vmem:[%s1509_s6 + $0xdc] sm:$0xf] }
  0x1f   : > { %209 = vst [vmem:[%s1514_s7 + $0x24] sm:$0xf] %v208_v9  ;;  %211 = vst [vmem:[%s1514_s7 + $0x28] sm:$0xf] %v210_v10  ;;  %v214_v12 = vld [vmem:[%s1509_s6 + $0xf0] sm:$0xf] }
  0x20   : > { %213 = vst [vmem:[%s1514_s7 + $0x2c] sm:$0xf] %v212_v11  ;;  %v216_v13 = vld [vmem:[%s1509_s6 + $0x104] sm:$0xf]  ;;  %v218_v14 = vld [vmem:[%s1509_s6 + $0x118] sm:$0xf] }
  0x21   : > { %215 = vst [vmem:[%s1514_s7 + $0x30] sm:$0xf] %v214_v12  ;;  %217 = vst [vmem:[%s1514_s7 + $0x34] sm:$0xf] %v216_v13  ;;  %v220_v15 = vld [vmem:[%s1509_s6 + $0x12c] sm:$0xf] }
  0x22   : > { %219 = vst [vmem:[%s1514_s7 + $0x38] sm:$0xf] %v218_v14  ;;  %v222_v16 = vld [vmem:[%s1509_s6 + $0x140] sm:$0xf]  ;;  %v224_v17 = vld [vmem:[%s1509_s6 + $0x154] sm:$0xf] }
  0x23   : > { %221 = vst [vmem:[%s1514_s7 + $0x3c] sm:$0xf] %v220_v15  ;;  %223 = vst [vmem:[%s1514_s7 + $0x40] sm:$0xf] %v222_v16  ;;  %v226_v18 = vld [vmem:[%s1509_s6 + $0x168] sm:$0xf] }
  0x24   : > { %225 = vst [vmem:[%s1514_s7 + $0x44] sm:$0xf] %v224_v17  ;;  %v228_v19 = vld [vmem:[%s1509_s6 + $0x17c] sm:$0xf]  ;;  %v230_v20 = vld [vmem:[%s1509_s6 + $0x190] sm:$0xf] }
  0x25   : > { %227 = vst [vmem:[%s1514_s7 + $0x48] sm:$0xf] %v226_v18  ;;  %229 = vst [vmem:[%s1514_s7 + $0x4c] sm:$0xf] %v228_v19  ;;  %v232_v21 = vld [vmem:[%s1509_s6 + $0x1a4] sm:$0xf] }
  0x26   : > { %231 = vst [vmem:[%s1514_s7 + $0x50] sm:$0xf] %v230_v20  ;;  %v234_v22 = vld [vmem:[%s1509_s6 + $0x1b8] sm:$0xf]  ;;  %v236_v23 = vld [vmem:[%s1509_s6 + $0x1cc] sm:$0xf] }
  0x27   : > { %233 = vst [vmem:[%s1514_s7 + $0x54] sm:$0xf] %v232_v21  ;;  %235 = vst [vmem:[%s1514_s7 + $0x58] sm:$0xf] %v234_v22  ;;  %v238_v24 = vld [vmem:[%s1509_s6 + $0x1e0] sm:$0xf] }
  0x28   : > { %237 = vst [vmem:[%s1514_s7 + $0x5c] sm:$0xf] %v236_v23  ;;  %v240_v25 = vld [vmem:[%s1509_s6 + $0x1f4] sm:$0xf]  ;;  %v242_v26 = vld [vmem:[%s1509_s6 + $0x208] sm:$0xf] }
  0x29   : > { %239 = vst [vmem:[%s1514_s7 + $0x60] sm:$0xf] %v238_v24  ;;  %241 = vst [vmem:[%s1514_s7 + $0x64] sm:$0xf] %v240_v25  ;;  %v244_v27 = vld [vmem:[%s1509_s6 + $0x21c] sm:$0xf] }
  0x2a   : > { %243 = vst [vmem:[%s1514_s7 + $0x68] sm:$0xf] %v242_v26  ;;  %v246_v28 = vld [vmem:[%s1509_s6 + $0x230] sm:$0xf]  ;;  %v248_v29 = vld [vmem:[%s1509_s6 + $0x244] sm:$0xf] }
  0x2b   : > { %245 = vst [vmem:[%s1514_s7 + $0x6c] sm:$0xf] %v244_v27  ;;  %247 = vst [vmem:[%s1514_s7 + $0x70] sm:$0xf] %v246_v28  ;;  %v250_v30 = vld [vmem:[%s1509_s6 + $0x258] sm:$0xf] }
  0x2c   : > { %249 = vst [vmem:[%s1514_s7 + $0x74] sm:$0xf] %v248_v29  ;;  %v252_v31 = vld [vmem:[%s1509_s6 + $0x26c] sm:$0xf]  ;;  %251 = vst [vmem:[%s1514_s7 + $0x78] sm:$0xf] %v250_v30 }
  0x2d   : > { %253 = vst [vmem:[%s1514_s7 + $0x7c] sm:$0xf] %v252_v31 }
  0x2e PF: > { %p1167_p7 = scmp.ge.s32.totalorder %s1426_s18, 1  ;;  %p351_p8 = scmp.lt.s32.totalorder %s1426_s18, 11 }
  0x30   : > { %p352_p9 = pnand %p1167_p7, %p351_p8 }
  0x31   : > { %s358_s8 = sand.u32 (!%p352_p9), 1, %s1402_s12   ;;  %s1169_s9 = sshll.u32 (!%p352_p9), %s1410_s14, 4 }
  0x32   : > { %355 = sbr.rel (%p352_p9) target bundleno = 363 (0x16b), region = 69  ;;  %s1168_s10 = sshll.u32 (!%p352_p9), %s358_s8, 7 }
  0x33   : > { %p397_p10 = scmp.lt.s32.totalorder (!%p352_p9), %s1169_s9, 79  ;;  %s1171_s11 = sshll.u32 (!%p352_p9), %s1414_s15, 5 }
  0x34   : > { %p409_p11 = scmp.lt.s32.totalorder (!%p352_p9), %s1171_s11, 63  ;;  %s1592_s12 = scalar_lea.vmem (!%p352_p9), [#allocation3], %s1168_s10 }
  0x35   : > { %p1173_p12 = scmp.ne.s32.totalorder (!%p352_p9), %s1410_s14, 0 }
  0x39   : > { %s1727_s9 = smov (!%p397_p10, %s1169_s9), 79  ;;  %s1729_s11 = smov (!%p409_p11, %s1171_s11), 63 }
  0x3a   : > { %s1170_s21 = sshll.u32 %s1727_s9, 2  ;;  %s1172_s26 = sshll.u32 %s1729_s11, 3  ;;  %v1428_v32 = vmov (!%p1173_p12), 0.0  }
  0x3b   : > { %s1585_s24 = scalar_lea.vmem %s1711_s1, %s1170_s21  ;;  %s1590_s29 = scalar_lea.vmem %s1713_s3, %s1172_s26  ;;  %422 = vst [vmem:[#allocation2] sm:$0xff] (!%p1173_p12), %v1428_v32  ;;  %423 = vst [vmem:[#allocation2 + $0x8] sm:$0xff] (!%p1173_p12), %v1428_v32 }
  0x3c   : > { %421 = sbr.rel (%p1173_p12) target bundleno = 75 (0x4b), region = 77  ;;  %424 = vst [vmem:[#allocation2 + $0x10] sm:$0xff] (!%p1173_p12), %v1428_v32  ;;  %425 = vst [vmem:[#allocation2 + $0x18] sm:$0xff] (!%p1173_p12), %v1428_v32 }
  0x3d   : > { %426 = vst [vmem:[#allocation2 + $0x20] sm:$0xff] (!%p1173_p12), %v1428_v32  ;;  %427 = vst [vmem:[#allocation2 + $0x28] sm:$0xff] (!%p1173_p12), %v1428_v32 }
  0x3e   : > { %428 = vst [vmem:[#allocation2 + $0x30] sm:$0xff] (!%p1173_p12), %v1428_v32  ;;  %429 = vst [vmem:[#allocation2 + $0x38] sm:$0xff] (!%p1173_p12), %v1428_v32 }
  0x3f   : > { %430 = vst [vmem:[#allocation2 + $0x40] sm:$0xff] (!%p1173_p12), %v1428_v32  ;;  %431 = vst [vmem:[#allocation2 + $0x48] sm:$0xff] (!%p1173_p12), %v1428_v32 }
  0x40   : > { %432 = vst [vmem:[#allocation2 + $0x50] sm:$0xff] (!%p1173_p12), %v1428_v32  ;;  %433 = vst [vmem:[#allocation2 + $0x58] sm:$0xff] (!%p1173_p12), %v1428_v32 }
  0x41   : > { %434 = vst [vmem:[#allocation2 + $0x60] sm:$0xff] (!%p1173_p12), %v1428_v32  ;;  %435 = vst [vmem:[#allocation2 + $0x68] sm:$0xff] (!%p1173_p12), %v1428_v32 }
  0x42   : > { %436 = vst [vmem:[#allocation2 + $0x70] sm:$0xff] (!%p1173_p12), %v1428_v32  ;;  %437 = vst [vmem:[#allocation2 + $0x78] sm:$0xff] (!%p1173_p12), %v1428_v32 }
  0x43   : > { %438 = vst [vmem:[#allocation2 + $0x80] sm:$0xff] %v1428_v32  ;;  %439 = vst [vmem:[#allocation2 + $0x88] sm:$0xff] %v1428_v32 }
  0x44   : > { %440 = vst [vmem:[#allocation2 + $0x90] sm:$0xff] %v1428_v32  ;;  %441 = vst [vmem:[#allocation2 + $0x98] sm:$0xff] %v1428_v32 }
  0x45   : > { %442 = vst [vmem:[#allocation2 + $0xa0] sm:$0xff] %v1428_v32  ;;  %443 = vst [vmem:[#allocation2 + $0xa8] sm:$0xff] %v1428_v32 }
  0x46   : > { %444 = vst [vmem:[#allocation2 + $0xb0] sm:$0xff] %v1428_v32  ;;  %445 = vst [vmem:[#allocation2 + $0xb8] sm:$0xff] %v1428_v32 }
  0x47   : > { %446 = vst [vmem:[#allocation2 + $0xc0] sm:$0xff] %v1428_v32  ;;  %447 = vst [vmem:[#allocation2 + $0xc8] sm:$0xff] %v1428_v32 }
  0x48   : > { %448 = vst [vmem:[#allocation2 + $0xd0] sm:$0xff] %v1428_v32  ;;  %449 = vst [vmem:[#allocation2 + $0xd8] sm:$0xff] %v1428_v32 }
  0x49   : > { %450 = vst [vmem:[#allocation2 + $0xe0] sm:$0xff] %v1428_v32  ;;  %451 = vst [vmem:[#allocation2 + $0xe8] sm:$0xff] %v1428_v32 }
  0x4a   : > { %452 = vst [vmem:[#allocation2 + $0xf0] sm:$0xff] %v1428_v32  ;;  %453 = vst [vmem:[#allocation2 + $0xf8] sm:$0xff] %v1428_v32 }
  0x4b PF: > { %v1348_v33 = vld [vmem:[%s1585_s24] sm:$0xff]   ;;  %v1349_v34 = vld [vmem:[%s1585_s24 + $0x8] sm:$0xff]   ;;  %v1350_v35 = vld [vmem:[%s1585_s24 + $0x10] sm:$0xff]   ;;  %p1198_p13 = scmp.ne.s32.totalorder %s1410_s14, 4 }
  0x4c   : > { %1226 = vmatprep.subr.bf16.mxu0 %v1348_v33  ;;  %1274 = vmatprep.subr.bf16.mxu1 %v1348_v33  ;;  %v1351_v36 = vld [vmem:[%s1585_s24 + $0x18] sm:$0xff]   ;;  %v1356_v37 = vld [vmem:[%s1592_s12] sm:$0xff]   ;;  %v1353_v40 = vld [vmem:[%s1585_s24 + $0x28] sm:$0xff]  }
  0x4d   : > { %1227 = vmatpush3.bf16.msra.mxu0 %v1348_v33  ;;  %1282 = vmatpush3.bf16.msra.mxu1 %v1348_v33  ;;  %v1357_v38 = vld [vmem:[%s1592_s12 + $0x40] sm:$0xff]   ;;  %v1354_v41 = vld [vmem:[%s1585_s24 + $0x30] sm:$0xff]   ;;  %v1355_v42 = vld [vmem:[%s1585_s24 + $0x38] sm:$0xff]  }
  0x4e   : > { %1228 = vmatprep.subr.bf16.mxu0 %v1349_v34  ;;  %1275 = vmatprep.subr.bf16.mxu1 %v1349_v34  ;;  %v1352_v39 = vld [vmem:[%s1585_s24 + $0x20] sm:$0xff]   ;;  %v1358_v43 = vld [vmem:[%s1592_s12 + $0x8] sm:$0xff]   ;;  %v1360_v45 = vld [vmem:[%s1592_s12 + $0x10] sm:$0xff]  }
  0x4f   : > { %1242 = vmatprep.mubr.bf16.mxu0 %v1356_v37  ;;  %1258 = vmatprep.mubr.bf16.mxu1 %v1357_v38  ;;  %v1359_v44 = vld [vmem:[%s1592_s12 + $0x48] sm:$0xff]   ;;  %v1361_v46 = vld [vmem:[%s1592_s12 + $0x50] sm:$0xff]   ;;  %v1362_v47 = vld [vmem:[%s1592_s12 + $0x18] sm:$0xff]  }
  0x50   : > { %v1363_v48 = vld [vmem:[%s1592_s12 + $0x58] sm:$0xff]   ;;  %v1364_v49 = vld [vmem:[%s1592_s12 + $0x20] sm:$0xff]   ;;  %v1366_v51 = vld [vmem:[%s1592_s12 + $0x28] sm:$0xff]  }
  0x51   : > { %1229 = vmatpush3.bf16.msra.mxu0 %v1349_v34  ;;  %1283 = vmatpush3.bf16.msra.mxu1 %v1349_v34  ;;  %v1365_v50 = vld [vmem:[%s1592_s12 + $0x60] sm:$0xff]   ;;  %v1367_v52 = vld [vmem:[%s1592_s12 + $0x68] sm:$0xff]   ;;  %v1368_v53 = vld [vmem:[%s1592_s12 + $0x30] sm:$0xff]  }
  0x52   : > { %1230 = vmatprep.subr.bf16.mxu0 %v1350_v35  ;;  %1276 = vmatprep.subr.bf16.mxu1 %v1350_v35  ;;  %v1369_v54 = vld [vmem:[%s1592_s12 + $0x70] sm:$0xff]   ;;  %v1370_v55 = vld [vmem:[%s1592_s12 + $0x38] sm:$0xff]   ;;  %v454_v59 = vld [vmem:[#allocation2] sm:$0xff] }
  0x53   : > { %v1371_v56 = vld [vmem:[%s1592_s12 + $0x78] sm:$0xff]   ;;  %v456_v57 = vld [vmem:[#allocation2 + $0x10] sm:$0xff]  ;;  %v470_v60 = vld [vmem:[#allocation2 + $0x80] sm:$0xff] }
  0x54   : > { %v472_v58 = vld [vmem:[#allocation2 + $0x90] sm:$0xff]  ;;  %v457_v63 = vld [vmem:[#allocation2 + $0x18] sm:$0xff]  ;;  %v455_v5 = vld [vmem:[#allocation2 + $0x8] sm:$0xff] }
  0x55   : > { %1231 = vmatpush3.bf16.msra.mxu0 %v1350_v35  ;;  %1284 = vmatpush3.bf16.msra.mxu1 %v1350_v35  ;;  %v473_v0 = vld [vmem:[#allocation2 + $0x98] sm:$0xff]  ;;  %v471_v6 = vld [vmem:[#allocation2 + $0x88] sm:$0xff]  ;;  %v460_v17 = vld [vmem:[#allocation2 + $0x30] sm:$0xff] }
  0x56   : > { %1232 = vmatprep.subr.bf16.mxu0 %v1351_v36  ;;  %1277 = vmatprep.subr.bf16.mxu1 %v1351_v36  ;;  %v476_v18 = vld [vmem:[#allocation2 + $0xb0] sm:$0xff]  ;;  %v458_v19 = vld [vmem:[#allocation2 + $0x20] sm:$0xff]  ;;  %v461_v23 = vld [vmem:[#allocation2 + $0x38] sm:$0xff] }
  0x57   : > { %v474_v20 = vld [vmem:[#allocation2 + $0xa0] sm:$0xff]  ;;  %v477_v24 = vld [vmem:[#allocation2 + $0xb8] sm:$0xff]  ;;  %v459_v29 = vld [vmem:[#allocation2 + $0x28] sm:$0xff] }
  0x58   : > { %v475_v30 = vld [vmem:[#allocation2 + $0xa8] sm:$0xff] }
  0x59   : > { %1233 = vmatpush3.bf16.msra.mxu0 %v1351_v36  ;;  %1285 = vmatpush3.bf16.msra.mxu1 %v1351_v36 }
  0x5a   : > { %1234 = vmatprep.subr.bf16.mxu0 %v1352_v39  ;;  %1278 = vmatprep.subr.bf16.mxu1 %v1352_v39 }
  0x5d   : > { %1235 = vmatpush3.bf16.msra.mxu0 %v1352_v39  ;;  %1286 = vmatpush3.bf16.msra.mxu1 %v1352_v39 }
  0x5e   : > { %1236 = vmatprep.subr.bf16.mxu0 %v1353_v40  ;;  %1279 = vmatprep.subr.bf16.mxu1 %v1353_v40 }
  0x61   : > { %1237 = vmatpush3.bf16.msra.mxu0 %v1353_v40  ;;  %1287 = vmatpush3.bf16.msra.mxu1 %v1353_v40 }
  0x62   : > { %1238 = vmatprep.subr.bf16.mxu0 %v1354_v41  ;;  %1280 = vmatprep.subr.bf16.mxu1 %v1354_v41 }
  0x65   : > { %1239 = vmatpush3.bf16.msra.mxu0 %v1354_v41  ;;  %1288 = vmatpush3.bf16.msra.mxu1 %v1354_v41  ;;  %v464_v41 = vld [vmem:[#allocation2 + $0x50] sm:$0xff] }
  0x66   : > { %1240 = vmatprep.subr.bf16.mxu0 %v1355_v42  ;;  %1281 = vmatprep.subr.bf16.mxu1 %v1355_v42 }
  0x69   : > { %1241 = vmatpush3.bf16.msra.mxu0 %v1355_v42  ;;  %1289 = vmatpush3.bf16.msra.mxu1 %v1355_v42  ;;  %v480_v42 = vld [vmem:[#allocation2 + $0xd0] sm:$0xff] }
  0x6c   : > { %1243 = vmatmul.mubr.bf16.vlgmr.msra.gmra.mrb[0].mxu0 %v1358_v43  ;;  %1259 = vmatmul.mubr.bf16.vlgmr.msra.gmra.mrb[0].mxu1 %v1359_v44  ;;  %v462_v43 = vld [vmem:[#allocation2 + $0x40] sm:$0xff] }
  0x6d   : > { %1246 = vmatprep.mubr.bf16.mxu0 %v1360_v45  ;;  %1262 = vmatprep.mubr.bf16.mxu1 %v1361_v46  ;;  %v478_v44 = vld [vmem:[#allocation2 + $0xc0] sm:$0xff] }
  0x74   : > { %1247 = vmatmul.mubr.bf16.gmra.mrb[4].mxu0 %v1362_v47  ;;  %1263 = vmatmul.mubr.bf16.gmra.mrb[4].mxu1 %v1363_v48  ;;  %v465_v47 = vld [vmem:[#allocation2 + $0x58] sm:$0xff] }
  0x75   : > { %1250 = vmatprep.mubr.bf16.mxu0 %v1364_v49  ;;  %1266 = vmatprep.mubr.bf16.mxu1 %v1365_v50  ;;  %v481_v48 = vld [vmem:[#allocation2 + $0xd8] sm:$0xff] }
  0x7c   : > { %1251 = vmatmul.mubr.bf16.gmra.mrb[8].mxu0 %v1366_v51  ;;  %1267 = vmatmul.mubr.bf16.gmra.mrb[8].mxu1 %v1367_v52 }
  0x7d   : > { %1254 = vmatprep.mubr.bf16.mxu0 %v1368_v53  ;;  %1270 = vmatprep.mubr.bf16.mxu1 %v1369_v54  ;;  %v463_v53 = vld [vmem:[#allocation2 + $0x48] sm:$0xff] }
  0x7e   : > { %v479_v54 = vld [vmem:[#allocation2 + $0xc8] sm:$0xff] }
  0x84   : > { %1255 = vmatmul.mubr.bf16.gmra.mrb[12].mxu0 %v1370_v55  ;;  %1271 = vmatmul.mubr.bf16.gmra.mrb[12].mxu1 %v1371_v56 }
 0x13f   : > { %v1244_v61 = vpop.f32.mrb[0].mxu0  ;;  %v1260_v62 = vpop.f32.mrb[0].mxu1 }
 0x140   : > { %v841_v1 = vadd.f32 %v1244_v61, %v456_v57  ;;  %v857_v2 = vadd.f32 %v1260_v62, %v472_v58  ;;  %v712_v3 = vpop.f32.mrb[1].mxu0  ;;  %v776_v4 = vpop.f32.mrb[1].mxu1 }
 0x141   : > { %v839_v7 = vadd.f32 %v712_v3, %v454_v59  ;;  %v855_v8 = vadd.f32 %v776_v4, %v470_v60  ;;  %v1245_v9 = vpop.f32.mrb[2].mxu0  ;;  %v1261_v10 = vpop.f32.mrb[2].mxu1  ;;  %v466_v3 = vld [vmem:[#allocation2 + $0x60] sm:$0xff] }
 0x142   : > { %873 = vst [vmem:[#allocation2 + $0x10] sm:$0xff] %v841_v1  ;;  %889 = vst [vmem:[#allocation2 + $0x90] sm:$0xff] %v857_v2  ;;  %v842_v11 = vadd.f32 %v1245_v9, %v457_v63  ;;  %v858_v12 = vadd.f32 %v1261_v10, %v473_v0  ;;  %v715_v13 = vpop.f32.mrb[3].mxu0  ;;  %v779_v14 = vpop.f32.mrb[3].mxu1  ;;  %v468_v1 = vld [vmem:[#allocation2 + $0x70] sm:$0xff]  ;;  %v482_v4 = vld [vmem:[#allocation2 + $0xe0] sm:$0xff] }
 0x143   : > { %871 = vst [vmem:[#allocation2] sm:$0xff] %v839_v7  ;;  %887 = vst [vmem:[#allocation2 + $0x80] sm:$0xff] %v855_v8  ;;  %v840_v15 = vadd.f32 %v715_v13, %v455_v5  ;;  %v856_v16 = vadd.f32 %v779_v14, %v471_v6  ;;  %v484_v2 = vld [vmem:[#allocation2 + $0xf0] sm:$0xff]  ;;  %v469_v7 = vld [vmem:[#allocation2 + $0x78] sm:$0xff] }
 0x144   : > { %874 = vst [vmem:[#allocation2 + $0x18] sm:$0xff] %v842_v11  ;;  %890 = vst [vmem:[#allocation2 + $0x98] sm:$0xff] %v858_v12  ;;  %v485_v8 = vld [vmem:[#allocation2 + $0xf8] sm:$0xff]  ;;  %v467_v13 = vld [vmem:[#allocation2 + $0x68] sm:$0xff] }
 0x145   : > { %872 = vst [vmem:[#allocation2 + $0x8] sm:$0xff] %v840_v15  ;;  %888 = vst [vmem:[#allocation2 + $0x88] sm:$0xff] %v856_v16  ;;  %v483_v14 = vld [vmem:[#allocation2 + $0xe8] sm:$0xff] }
 0x147   : > { %v1248_v21 = vpop.f32.mrb[4].mxu0  ;;  %v1264_v22 = vpop.f32.mrb[4].mxu1 }
 0x148   : > { %v845_v25 = vadd.f32 %v1248_v21, %v460_v17  ;;  %v861_v26 = vadd.f32 %v1264_v22, %v476_v18  ;;  %v728_v27 = vpop.f32.mrb[5].mxu0  ;;  %v792_v28 = vpop.f32.mrb[5].mxu1 }
 0x149   : > { %v843_v31 = vadd.f32 %v728_v27, %v458_v19  ;;  %v859_v32 = vadd.f32 %v792_v28, %v474_v20  ;;  %v1249_v33 = vpop.f32.mrb[6].mxu0  ;;  %v1265_v34 = vpop.f32.mrb[6].mxu1 }
 0x14a   : > { %877 = vst [vmem:[#allocation2 + $0x30] sm:$0xff] %v845_v25  ;;  %893 = vst [vmem:[#allocation2 + $0xb0] sm:$0xff] %v861_v26  ;;  %v846_v35 = vadd.f32 %v1249_v33, %v461_v23  ;;  %v862_v36 = vadd.f32 %v1265_v34, %v477_v24  ;;  %v731_v37 = vpop.f32.mrb[7].mxu0  ;;  %v795_v38 = vpop.f32.mrb[7].mxu1  ;;  %v907_v25 = vld [vmem:[#allocation2] sm:$0xff] (!%p1198_p13) }
 0x14b   : > { %875 = vst [vmem:[#allocation2 + $0x20] sm:$0xff] %v843_v31  ;;  %891 = vst [vmem:[#allocation2 + $0xa0] sm:$0xff] %v859_v32  ;;  %v844_v39 = vadd.f32 %v731_v37, %v459_v29  ;;  %v860_v40 = vadd.f32 %v795_v38, %v475_v30  ;;  %v1623_v26 = vld [vmem:[%s1712_s2] ss:$0 sm:$0xff] (!%p1198_p13)  ;;  %v909_v30 = vld [vmem:[#allocation2 + $0x10] sm:$0xff] (!%p1198_p13) }
 0x14c   : > { %878 = vst [vmem:[#allocation2 + $0x38] sm:$0xff] %v846_v35  ;;  %894 = vst [vmem:[#allocation2 + $0xb8] sm:$0xff] %v862_v36  ;;  %v908_v27 = vld [vmem:[#allocation2 + $0x8] sm:$0xff] (!%p1198_p13)  ;;  %v946_v28 = vadd.f32 (!%p1198_p13), %v1623_v26, %v907_v25  ;;  %v910_v31 = vld [vmem:[#allocation2 + $0x18] sm:$0xff] (!%p1198_p13)  ;;  %v948_v33 = vadd.f32 (!%p1198_p13), %v1623_v26, %v909_v30 }
 0x14d   : > { %876 = vst [vmem:[#allocation2 + $0x28] sm:$0xff] %v844_v39  ;;  %892 = vst [vmem:[#allocation2 + $0xa8] sm:$0xff] %v860_v40  ;;  %v947_v29 = vadd.f32 (!%p1198_p13), %v1623_v26, %v908_v27  ;;  %v949_v34 = vadd.f32 (!%p1198_p13), %v1623_v26, %v910_v31 }
 0x14e   : > { %v978_v39 = vmax.f32 (!%p1198_p13), %v946_v28, 0.0 }
 0x14f   : > { %v1252_v45 = vpop.f32.mrb[8].mxu0  ;;  %v1268_v46 = vpop.f32.mrb[8].mxu1  ;;  %v979_v40 = vmax.f32 (!%p1198_p13), %v947_v29, 0.0 }
 0x150   : > { %v849_v49 = vadd.f32 %v1252_v45, %v464_v41  ;;  %v865_v50 = vadd.f32 %v1268_v46, %v480_v42  ;;  %v744_v51 = vpop.f32.mrb[9].mxu0  ;;  %v808_v52 = vpop.f32.mrb[9].mxu1  ;;  %v980_v46 = vmax.f32 (!%p1198_p13), %v948_v33, 0.0  ;;  %1010 = vst [vmem:[%s1590_s29] sm:$0xff] (!%p1198_p13), %v978_v39 }
 0x151   : > { %v847_v55 = vadd.f32 %v744_v51, %v462_v43  ;;  %v863_v56 = vadd.f32 %v808_v52, %v478_v44  ;;  %v1253_v57 = vpop.f32.mrb[10].mxu0  ;;  %v1269_v58 = vpop.f32.mrb[10].mxu1  ;;  %v913_v37 = vld [vmem:[#allocation2 + $0x30] sm:$0xff] (!%p1198_p13)  ;;  %1011 = vst [vmem:[%s1590_s29 + $0x8] sm:$0xff] (!%p1198_p13), %v979_v40 }
 0x152   : > { %881 = vst [vmem:[#allocation2 + $0x50] sm:$0xff] %v849_v49  ;;  %897 = vst [vmem:[#allocation2 + $0xd0] sm:$0xff] %v865_v50  ;;  %v850_v59 = vadd.f32 %v1253_v57, %v465_v47  ;;  %v866_v60 = vadd.f32 %v1269_v58, %v481_v48  ;;  %v747_v61 = vpop.f32.mrb[11].mxu0  ;;  %v811_v62 = vpop.f32.mrb[11].mxu1  ;;  %v911_v32 = vld [vmem:[#allocation2 + $0x20] sm:$0xff] (!%p1198_p13)  ;;  %v952_v42 = vadd.f32 (!%p1198_p13), %v1623_v26, %v913_v37  ;;  %v981_v47 = vmax.f32 (!%p1198_p13), %v949_v34, 0.0 }
 0x153   : > { %879 = vst [vmem:[#allocation2 + $0x40] sm:$0xff] %v847_v55  ;;  %895 = vst [vmem:[#allocation2 + $0xc0] sm:$0xff] %v863_v56  ;;  %v848_v63 = vadd.f32 %v747_v61, %v463_v53  ;;  %v864_v0 = vadd.f32 %v811_v62, %v479_v54  ;;  %v950_v35 = vadd.f32 (!%p1198_p13), %v1623_v26, %v911_v32  ;;  %v914_v38 = vld [vmem:[#allocation2 + $0x38] sm:$0xff] (!%p1198_p13) }
 0x154   : > { %882 = vst [vmem:[#allocation2 + $0x58] sm:$0xff] %v850_v59  ;;  %898 = vst [vmem:[#allocation2 + $0xd8] sm:$0xff] %v866_v60  ;;  %v912_v36 = vld [vmem:[#allocation2 + $0x28] sm:$0xff] (!%p1198_p13)  ;;  %v953_v49 = vadd.f32 (!%p1198_p13), %v1623_v26, %v914_v38  ;;  %v984_v54 = vmax.f32 (!%p1198_p13), %v952_v42, 0.0 }
 0x155   : > { %880 = vst [vmem:[#allocation2 + $0x48] sm:$0xff] %v848_v63  ;;  %896 = vst [vmem:[#allocation2 + $0xc8] sm:$0xff] %v864_v0  ;;  %v951_v41 = vadd.f32 (!%p1198_p13), %v1623_v26, %v912_v36  ;;  %v982_v48 = vmax.f32 (!%p1198_p13), %v950_v35, 0.0  ;;  %v923_v63 = vld [vmem:[#allocation2 + $0x80] sm:$0xff] (!%p1198_p13)  ;;  %v924_v0 = vld [vmem:[#allocation2 + $0x88] sm:$0xff] (!%p1198_p13) }
 0x156   : > { %1012 = vst [vmem:[%s1590_s29 + $0x10] sm:$0xff] (!%p1198_p13), %v980_v46  ;;  %1013 = vst [vmem:[%s1590_s29 + $0x18] sm:$0xff] (!%p1198_p13), %v981_v47  ;;  %v985_v59 = vmax.f32 (!%p1198_p13), %v953_v49, 0.0 }
 0x157   : > { %v1256_v5 = vpop.f32.mrb[12].mxu0  ;;  %v1272_v6 = vpop.f32.mrb[12].mxu1  ;;  %906 = sbr.rel (%p1198_p13) target bundleno = 363 (0x16b), region = 81  ;;  %v983_v53 = vmax.f32 (!%p1198_p13), %v951_v41, 0.0  ;;  %1014 = vst [vmem:[%s1590_s29 + $0x20] sm:$0xff] (!%p1198_p13), %v982_v48  ;;  %1016 = vst [vmem:[%s1590_s29 + $0x30] sm:$0xff] (!%p1198_p13), %v984_v54 }
 0x158   : > { %v853_v9 = vadd.f32 %v1256_v5, %v468_v1  ;;  %v869_v10 = vadd.f32 %v1272_v6, %v484_v2  ;;  %v760_v11 = vpop.f32.mrb[13].mxu0  ;;  %v824_v12 = vpop.f32.mrb[13].mxu1  ;;  %v925_v5 = vld [vmem:[#allocation2 + $0x90] sm:$0xff] (!%p1198_p13)  ;;  %v926_v6 = vld [vmem:[#allocation2 + $0x98] sm:$0xff] (!%p1198_p13)  ;;  %1017 = vst [vmem:[%s1590_s29 + $0x38] sm:$0xff] (!%p1198_p13), %v985_v59 }
 0x159   : > { %v851_v15 = vadd.f32 %v760_v11, %v466_v3  ;;  %v867_v16 = vadd.f32 %v824_v12, %v482_v4  ;;  %v1257_v17 = vpop.f32.mrb[14].mxu0  ;;  %v1273_v18 = vpop.f32.mrb[14].mxu1  ;;  %v917_v45 = vld [vmem:[#allocation2 + $0x50] sm:$0xff] (!%p1198_p13)  ;;  %1015 = vst [vmem:[%s1590_s29 + $0x28] sm:$0xff] (!%p1198_p13), %v983_v53  ;;  %v928_v12 = vld [vmem:[#allocation2 + $0xa8] sm:$0xff] (!%p1198_p13) }
 0x15a   : > { %885 = vst [vmem:[#allocation2 + $0x70] sm:$0xff] %v853_v9  ;;  %901 = vst [vmem:[#allocation2 + $0xf0] sm:$0xff] %v869_v10  ;;  %v854_v19 = vadd.f32 %v1257_v17, %v469_v7  ;;  %v870_v20 = vadd.f32 %v1273_v18, %v485_v8  ;;  %v763_v21 = vpop.f32.mrb[15].mxu0  ;;  %v827_v22 = vpop.f32.mrb[15].mxu1  ;;  %v915_v43 = vld [vmem:[#allocation2 + $0x40] sm:$0xff] (!%p1198_p13)  ;;  %v956_v60 = vadd.f32 (!%p1198_p13), %v1623_v26, %v917_v45  ;;  %v930_v18 = vld [vmem:[#allocation2 + $0xb8] sm:$0xff] (!%p1198_p13) }
 0x15b   : > { %883 = vst [vmem:[#allocation2 + $0x60] sm:$0xff] %v851_v15  ;;  %899 = vst [vmem:[#allocation2 + $0xe0] sm:$0xff] %v867_v16  ;;  %v852_v23 = vadd.f32 %v763_v21, %v467_v13  ;;  %v868_v24 = vadd.f32 %v827_v22, %v483_v14  ;;  %v918_v50 = vld [vmem:[#allocation2 + $0x58] sm:$0xff] (!%p1198_p13)  ;;  %v954_v55 = vadd.f32 (!%p1198_p13), %v1623_v26, %v915_v43  ;;  %v927_v7 = vld [vmem:[#allocation2 + $0xa0] sm:$0xff] (!%p1198_p13) }
 0x15c   : > { %886 = vst [vmem:[#allocation2 + $0x78] sm:$0xff] %v854_v19  ;;  %902 = vst [vmem:[#allocation2 + $0xf8] sm:$0xff] %v870_v20  ;;  %v916_v44 = vld [vmem:[#allocation2 + $0x48] sm:$0xff] (!%p1198_p13)  ;;  %v957_v61 = vadd.f32 (!%p1198_p13), %v1623_v26, %v918_v50  ;;  %v988_v8 = vmax.f32 (!%p1198_p13), %v956_v60, 0.0  ;;  %v929_v13 = vld [vmem:[#allocation2 + $0xb0] sm:$0xff] (!%p1198_p13)  ;;  %v962_v16 = vadd.f32 (!%p1198_p13), %v1623_v26, %v923_v63  ;;  %v963_v17 = vadd.f32 (!%p1198_p13), %v1623_v26, %v924_v0 }
 0x15d   : > { %884 = vst [vmem:[#allocation2 + $0x68] sm:$0xff] %v852_v23  ;;  %900 = vst [vmem:[#allocation2 + $0xe8] sm:$0xff] %v868_v24  ;;  %v955_v56 = vadd.f32 (!%p1198_p13), %v1623_v26, %v916_v44  ;;  %v986_v1 = vmax.f32 (!%p1198_p13), %v954_v55, 0.0  ;;  %v964_v20 = vadd.f32 (!%p1198_p13), %v1623_v26, %v925_v5  ;;  %v965_v21 = vadd.f32 (!%p1198_p13), %v1623_v26, %v926_v6  ;;  %v931_v23 = vld [vmem:[#allocation2 + $0xc0] sm:$0xff] (!%p1198_p13)  ;;  %v932_v24 = vld [vmem:[#allocation2 + $0xc8] sm:$0xff] (!%p1198_p13) }
 0x15e   : > { %v989_v9 = vmax.f32 %v957_v61, 0.0  ;;  %1020 = vst [vmem:[%s1590_s29 + $0x50] sm:$0xff] %v988_v8  ;;  %v966_v22 = vadd.f32 %v1623_v26, %v927_v7  ;;  %v994_v25 = vmax.f32 %v962_v16, 0.0  ;;  %v995_v27 = vmax.f32 %v963_v17, 0.0  ;;  %v933_v30 = vld [vmem:[#allocation2 + $0xd0] sm:$0xff]  ;;  %v934_v31 = vld [vmem:[#allocation2 + $0xd8] sm:$0xff] }
 0x15f   : > { %v987_v2 = vmax.f32 %v955_v56, 0.0  ;;  %1018 = vst [vmem:[%s1590_s29 + $0x40] sm:$0xff] %v986_v1  ;;  %v967_v28 = vadd.f32 %v1623_v26, %v928_v12  ;;  %v968_v29 = vadd.f32 %v1623_v26, %v929_v13  ;;  %v996_v33 = vmax.f32 %v964_v20, 0.0 }
 0x160   : > { %1021 = vst [vmem:[%s1590_s29 + $0x58] sm:$0xff] %v989_v9  ;;  %v997_v34 = vmax.f32 %v965_v21, 0.0  ;;  %v998_v35 = vmax.f32 %v966_v22, 0.0  ;;  %v969_v36 = vadd.f32 %v1623_v26, %v930_v18  ;;  %1026 = vst [vmem:[%s1590_s29 + $0x80] sm:$0xff] %v994_v25  ;;  %v970_v41 = vadd.f32 %v1623_v26, %v931_v23 }
 0x161   : > { %v921_v57 = vld [vmem:[#allocation2 + $0x70] sm:$0xff]  ;;  %1019 = vst [vmem:[%s1590_s29 + $0x48] sm:$0xff] %v987_v2  ;;  %1027 = vst [vmem:[%s1590_s29 + $0x88] sm:$0xff] %v995_v27  ;;  %v999_v39 = vmax.f32 %v967_v28, 0.0  ;;  %v1000_v40 = vmax.f32 %v968_v29, 0.0  ;;  %v971_v42 = vadd.f32 %v1623_v26, %v932_v24  ;;  %v972_v45 = vadd.f32 %v1623_v26, %v933_v30 }
 0x162   : > { %v919_v51 = vld [vmem:[#allocation2 + $0x60] sm:$0xff]  ;;  %v960_v4 = vadd.f32 %v1623_v26, %v921_v57  ;;  %v937_v38 = vld [vmem:[#allocation2 + $0xf0] sm:$0xff]  ;;  %1028 = vst [vmem:[%s1590_s29 + $0x90] sm:$0xff] %v996_v33  ;;  %1029 = vst [vmem:[%s1590_s29 + $0x98] sm:$0xff] %v997_v34  ;;  %v1001_v44 = vmax.f32 %v969_v36, 0.0  ;;  %v973_v46 = vadd.f32 %v1623_v26, %v934_v31  ;;  %v1002_v48 = vmax.f32 %v970_v41, 0.0 }
 0x163   : > { %v922_v58 = vld [vmem:[#allocation2 + $0x78] sm:$0xff]  ;;  %v958_v62 = vadd.f32 %v1623_v26, %v919_v51  ;;  %v935_v32 = vld [vmem:[#allocation2 + $0xe0] sm:$0xff]  ;;  %1030 = vst [vmem:[%s1590_s29 + $0xa0] sm:$0xff] %v998_v35  ;;  %1031 = vst [vmem:[%s1590_s29 + $0xa8] sm:$0xff] %v999_v39  ;;  %v1003_v49 = vmax.f32 %v971_v42, 0.0  ;;  %v976_v51 = vadd.f32 %v1623_v26, %v937_v38 }
 0x164   : > { %v920_v52 = vld [vmem:[#allocation2 + $0x68] sm:$0xff]  ;;  %v961_v11 = vadd.f32 %v1623_v26, %v922_v58  ;;  %v992_v15 = vmax.f32 %v960_v4, 0.0  ;;  %v938_v43 = vld [vmem:[#allocation2 + $0xf8] sm:$0xff]  ;;  %v974_v47 = vadd.f32 %v1623_v26, %v935_v32  ;;  %1032 = vst [vmem:[%s1590_s29 + $0xb0] sm:$0xff] %v1000_v40  ;;  %1033 = vst [vmem:[%s1590_s29 + $0xb8] sm:$0xff] %v1001_v44  ;;  %v1005_v53 = vmax.f32 %v973_v46, 0.0 }
 0x165   : > { %v959_v3 = vadd.f32 %v1623_v26, %v920_v52  ;;  %v990_v10 = vmax.f32 %v958_v62, 0.0  ;;  %v936_v37 = vld [vmem:[#allocation2 + $0xe8] sm:$0xff]  ;;  %v1004_v52 = vmax.f32 %v972_v45, 0.0  ;;  %v977_v55 = vadd.f32 %v1623_v26, %v938_v43  ;;  %1034 = vst [vmem:[%s1590_s29 + $0xc0] sm:$0xff] %v1002_v48  ;;  %1035 = vst [vmem:[%s1590_s29 + $0xc8] sm:$0xff] %v1003_v49 }
 0x166   : > { %v993_v19 = vmax.f32 %v961_v11, 0.0  ;;  %1024 = vst [vmem:[%s1590_s29 + $0x70] sm:$0xff] %v992_v15  ;;  %v975_v50 = vadd.f32 %v1623_v26, %v936_v37  ;;  %v1006_v54 = vmax.f32 %v974_v47, 0.0  ;;  %v1008_v57 = vmax.f32 %v976_v51, 0.0  ;;  %1037 = vst [vmem:[%s1590_s29 + $0xd8] sm:$0xff] %v1005_v53 }
 0x167   : > { %v991_v14 = vmax.f32 %v959_v3, 0.0  ;;  %1022 = vst [vmem:[%s1590_s29 + $0x60] sm:$0xff] %v990_v10  ;;  %1036 = vst [vmem:[%s1590_s29 + $0xd0] sm:$0xff] %v1004_v52  ;;  %v1009_v58 = vmax.f32 %v977_v55, 0.0 }
 0x168   : > { %1025 = vst [vmem:[%s1590_s29 + $0x78] sm:$0xff] %v993_v19  ;;  %v1007_v56 = vmax.f32 %v975_v50, 0.0  ;;  %1038 = vst [vmem:[%s1590_s29 + $0xe0] sm:$0xff] %v1006_v54 }
 0x169   : > { %1023 = vst [vmem:[%s1590_s29 + $0x68] sm:$0xff] %v991_v14  ;;  %1040 = vst [vmem:[%s1590_s29 + $0xf0] sm:$0xff] %v1008_v57 }
 0x16a   : > { %1039 = vst [vmem:[%s1590_s29 + $0xe8] sm:$0xff] %v1007_v56  ;;  %1041 = vst [vmem:[%s1590_s29 + $0xf8] sm:$0xff] %v1009_v58 }
 0x16b PF: > { %s13_s18 = sadd.s32 1, %s1426_s18   ;;  %s1714_s12 = smov %s1406_s13 }
 0x16c   : > { %p10_p0 = scmp.ge.s32.totalorder %s13_s18, 12   ;;  %s1715_s13 = smov %s1500_s25 }
 0x16d   : > { %s1716_s14 = smov %s1418_s16  ;;  %s1717_s15 = smov %s1422_s17 }
 0x16e   : > { %s1718_s16 = smov %s1721_s19  ;;  %s1719_s17 = smov %s1725_s20 }
 0x16f   :  { %12 = sbr.rel (!%p10_p0) target bundleno = 4 (0x4), region = 122 }

// kernel: inception_b_forward.6
= control target key start
LH: loop header
LB: loop body
LE: loop exit
PB: predicated region body
PF: predicated region fallthrough
CT: control target
= control target key end

     0   :  { %s1047_s12 = smov 0   ;;  %s1049_s13 = smov 0   ;;  %s1203_s0 = inlined_call_operand.vmem [shape: bf16[128,896], index: 0, kind: input, shape index: {}]   ;;  %s1204_s1 = inlined_call_operand.vmem [shape: bf16[896,128], index: 1, kind: input, shape index: {}]   ;;  %s1205_s2 = inlined_call_operand.vmem [shape: f32[1,128], index: 2, kind: input, shape index: {}]   ;;  %s1206_s3 = inlined_call_operand.vmem [shape: f32[128,128], index: 3, kind: output, shape index: {}]  }
   0x1   :  { %s1051_s14 = smov 0   ;;  %s1053_s15 = smov 0  }
   0x2   :  { %s1055_s16 = smov 0  }
   0x3 LB: > { %s25_s17 = sadd.s32 1, %s1020_s15  ;;  %p48_p1 = scmp.ne.s32.totalorder %s1012_s13, %s1008_s12  ;;  %s1024_s16 = sphi %s1055_s16, %s13_s16   ;;  %s1020_s15 = sphi %s1053_s15, %s1210_s15   ;;  %s1016_s14 = sphi %s1051_s14, %s1209_s14   ;;  %s1012_s13 = sphi %s1049_s13, %s1208_s13   ;;  %s1008_s12 = sphi %s1047_s12, %s1207_s12  }
   0x4   : > { %p26_p0 = scmp.ge.s32.totalorder %s25_s17, 7  ;;  %p49_p2 = scmp.eq.s32.totalorder %s1024_s16, 0 }
   0x5   : > { %s41_s19 = sadd.s32 1, %s1012_s13  ;;  %p835_p5 = scmp.ge.s32.totalorder %s1024_s16, 7 }
   0x6   : > { %s1212_s17 = smov (%p26_p0, %s25_s17), 0  ;;  %p50_p3 = por %p49_p2, %p48_p1 }
   0x7   : > { %s37_s18 = ssub.s32 %s1020_s15, %s1212_s17  ;;  %162 = sbr.rel (%p835_p5) target bundleno = 28 (0x1c), region = 20 }
   0x8   : > { %p39_p4 = scmp.eq.s32.totalorder %s37_s18, 0 }
   0xa   : > { %s1082_s20 = scalar_select %p39_p4, %s1012_s13, %s41_s19  }
   0xe   : > { %165 = sbr.rel (!%p50_p3) target bundleno = 28 (0x1c), region = 24  ;;  %s167_s21 = sand.u32 (%p50_p3), 1, %s1012_s13  }
   0xf   : > { %s837_s22 = sshll.u32 (%p50_p3), %s1020_s15, 2  ;;  %s836_s23 = sshll.u32 (%p50_p3), %s167_s21, 6 }
  0x10   : > { %s1090_s26 = scalar_lea.vmem (%p50_p3), %s1203_s0, %s837_s22  ;;  %s169_s27 = scalar_lea.vmem (%p50_p3), [#allocation3], %s836_s23 }
  0x11   : > { %v190_v0 = vld [vmem:[%s1090_s26] sm:$0xf] (%p50_p3)  ;;  %v192_v1 = vld [vmem:[%s1090_s26 + $0x1c] sm:$0xf] (%p50_p3)  ;;  %v194_v2 = vld [vmem:[%s1090_s26 + $0x38] sm:$0xf] (%p50_p3) }
  0x12   : > { %191 = vst [vmem:[%s169_s27] sm:$0xf] (%p50_p3), %v190_v0  ;;  %193 = vst [vmem:[%s169_s27 + $0x4] sm:$0xf] (%p50_p3), %v192_v1  ;;  %v196_v3 = vld [vmem:[%s1090_s26 + $0x54] sm:$0xf] (%p50_p3) }
  0x13   : > { %v198_v4 = vld [vmem:[%s1090_s26 + $0x70] sm:$0xf] (%p50_p3)  ;;  %195 = vst [vmem:[%s169_s27 + $0x8] sm:$0xf] (%p50_p3), %v194_v2  ;;  %197 = vst [vmem:[%s169_s27 + $0xc] sm:$0xf] (%p50_p3), %v196_v3 }
  0x14   : > { %199 = vst [vmem:[%s169_s27 + $0x10] sm:$0xf] (%p50_p3), %v198_v4  ;;  %v200_v5 = vld [vmem:[%s1090_s26 + $0x8c] sm:$0xf] (%p50_p3)  ;;  %v202_v6 = vld [vmem:[%s1090_s26 + $0xa8] sm:$0xf] (%p50_p3) }
  0x15   : > { %v204_v7 = vld [vmem:[%s1090_s26 + $0xc4] sm:$0xf]  ;;  %201 = vst [vmem:[%s169_s27 + $0x14] sm:$0xf] %v200_v5  ;;  %203 = vst [vmem:[%s169_s27 + $0x18] sm:$0xf] %v202_v6 }
  0x16   : > { %205 = vst [vmem:[%s169_s27 + $0x1c] sm:$0xf] %v204_v7  ;;  %v206_v8 = vld [vmem:[%s1090_s26 + $0xe0] sm:$0xf]  ;;  %v208_v9 = vld [vmem:[%s1090_s26 + $0xfc] sm:$0xf] }
  0x17   : > { %v210_v10 = vld [vmem:[%s1090_s26 + $0x118] sm:$0xf]  ;;  %207 = vst [vmem:[%s169_s27 + $0x20] sm:$0xf] %v206_v8  ;;  %209 = vst [vmem:[%s169_s27 + $0x24] sm:$0xf] %v208_v9 }
  0x18   : > { %211 = vst [vmem:[%s169_s27 + $0x28] sm:$0xf] %v210_v10  ;;  %v212_v11 = vld [vmem:[%s1090_s26 + $0x134] sm:$0xf]  ;;  %v214_v12 = vld [vmem:[%s1090_s26 + $0x150] sm:$0xf] }
  0x19   : > { %v216_v13 = vld [vmem:[%s1090_s26 + $0x16c] sm:$0xf]  ;;  %213 = vst [vmem:[%s169_s27 + $0x2c] sm:$0xf] %v212_v11  ;;  %215 = vst [vmem:[%s169_s27 + $0x30] sm:$0xf] %v214_v12 }
  0x1a   : > { %217 = vst [vmem:[%s169_s27 + $0x34] sm:$0xf] %v216_v13  ;;  %v218_v14 = vld [vmem:[%s1090_s26 + $0x188] sm:$0xf]  ;;  %v220_v15 = vld [vmem:[%s1090_s26 + $0x1a4] sm:$0xf] }
  0x1b   : > { %219 = vst [vmem:[%s169_s27 + $0x38] sm:$0xf] %v218_v14  ;;  %221 = vst [vmem:[%s169_s27 + $0x3c] sm:$0xf] %v220_v15 }
  0x1c PF: > { %p838_p6 = scmp.ge.s32.totalorder %s1024_s16, 1  ;;  %p287_p7 = scmp.lt.s32.totalorder %s1024_s16, 8 }
  0x1e   : > { %p288_p8 = pnand %p838_p6, %p287_p7 }
  0x1f   : > { %s294_s28 = sand.u32 (!%p288_p8), 1, %s1008_s12   ;;  %s840_s29 = sshll.u32 (!%p288_p8), %s1016_s14, 4 }
  0x20   : > { %291 = sbr.rel (%p288_p8) target bundleno = 321 (0x141), region = 69  ;;  %s839_s30 = sshll.u32 (!%p288_p8), %s294_s28, 6 }
  0x21   : > { %p333_p9 = scmp.lt.s32.totalorder (!%p288_p8), %s840_s29, 111  ;;  %s1117_s8 = scalar_lea.vmem (!%p288_p8), [#allocation3], %s839_s30 }
  0x22   : > { %p842_p10 = scmp.ne.s32.totalorder (!%p288_p8), %s1016_s14, 0 }
  0x27   : > { %s1214_s29 = smov (!%p333_p9, %s840_s29), 111  ;;  %357 = sbr.rel (%p842_p10) target bundleno = 49 (0x31), region = 77 }
  0x28   : > { %s841_s4 = sshll.u32 %s1214_s29, 2  ;;  %v1026_v16 = vmov (!%p842_p10), 0.0  }
  0x29   : > { %s1115_s7 = scalar_lea.vmem %s1204_s1, %s841_s4  ;;  %358 = vst [vmem:[#allocation2] sm:$0xff] (!%p842_p10), %v1026_v16  ;;  %359 = vst [vmem:[#allocation2 + $0x8] sm:$0xff] (!%p842_p10), %v1026_v16 }
  0x2a   : > { %360 = vst [vmem:[#allocation2 + $0x10] sm:$0xff] (!%p842_p10), %v1026_v16  ;;  %361 = vst [vmem:[#allocation2 + $0x18] sm:$0xff] (!%p842_p10), %v1026_v16 }
  0x2b   : > { %362 = vst [vmem:[#allocation2 + $0x20] sm:$0xff] (!%p842_p10), %v1026_v16  ;;  %363 = vst [vmem:[#allocation2 + $0x28] sm:$0xff] (!%p842_p10), %v1026_v16 }
  0x2c   : > { %364 = vst [vmem:[#allocation2 + $0x30] sm:$0xff] (!%p842_p10), %v1026_v16  ;;  %365 = vst [vmem:[#allocation2 + $0x38] sm:$0xff] (!%p842_p10), %v1026_v16 }
  0x2d   : > { %366 = vst [vmem:[#allocation2 + $0x40] sm:$0xff] (!%p842_p10), %v1026_v16  ;;  %367 = vst [vmem:[#allocation2 + $0x48] sm:$0xff] (!%p842_p10), %v1026_v16 }
  0x2e   : > { %368 = vst [vmem:[#allocation2 + $0x50] sm:$0xff] %v1026_v16  ;;  %369 = vst [vmem:[#allocation2 + $0x58] sm:$0xff] %v1026_v16 }
  0x2f   : > { %370 = vst [vmem:[#allocation2 + $0x60] sm:$0xff] %v1026_v16  ;;  %371 = vst [vmem:[#allocation2 + $0x68] sm:$0xff] %v1026_v16 }
  0x30   : > { %372 = vst [vmem:[#allocation2 + $0x70] sm:$0xff] %v1026_v16  ;;  %373 = vst [vmem:[#allocation2 + $0x78] sm:$0xff] %v1026_v16 }
  0x31 PF: > { %v970_v17 = vld [vmem:[%s1115_s7] sm:$0xff]   ;;  %v971_v18 = vld [vmem:[%s1115_s7 + $0x8] sm:$0xff]   ;;  %v972_v19 = vld [vmem:[%s1115_s7 + $0x10] sm:$0xff]   ;;  %p859_p11 = scmp.ne.s32.totalorder %s1016_s14, 6 }
  0x32   : > { %881 = vmatprep.subr.bf16.mxu0 %v970_v17  ;;  %913 = vmatprep.subr.bf16.mxu1 %v970_v17  ;;  %v973_v20 = vld [vmem:[%s1115_s7 + $0x18] sm:$0xff]   ;;  %v978_v21 = vld [vmem:[%s1117_s8] sm:$0xff]   ;;  %v975_v24 = vld [vmem:[%s1115_s7 + $0x28] sm:$0xff]  }
  0x33   : > { %882 = vmatpush3.bf16.msra.mxu0 %v970_v17  ;;  %921 = vmatpush3.bf16.msra.mxu1 %v970_v17  ;;  %v979_v22 = vld [vmem:[%s1117_s8 + $0x20] sm:$0xff]   ;;  %v976_v25 = vld [vmem:[%s1115_s7 + $0x30] sm:$0xff]   ;;  %v977_v26 = vld [vmem:[%s1115_s7 + $0x38] sm:$0xff]  }
  0x34   : > { %883 = vmatprep.subr.bf16.mxu0 %v971_v18  ;;  %914 = vmatprep.subr.bf16.mxu1 %v971_v18  ;;  %v974_v23 = vld [vmem:[%s1115_s7 + $0x20] sm:$0xff]   ;;  %v980_v27 = vld [vmem:[%s1117_s8 + $0x8] sm:$0xff]   ;;  %v982_v29 = vld [vmem:[%s1117_s8 + $0x10] sm:$0xff]  }
  0x35   : > { %897 = vmatprep.mubr.bf16.mxu0 %v978_v21  ;;  %905 = vmatprep.mubr.bf16.mxu1 %v979_v22  ;;  %v981_v28 = vld [vmem:[%s1117_s8 + $0x28] sm:$0xff]   ;;  %v983_v30 = vld [vmem:[%s1117_s8 + $0x30] sm:$0xff]   ;;  %v984_v31 = vld [vmem:[%s1117_s8 + $0x18] sm:$0xff]  }
  0x36   : > { %v985_v32 = vld [vmem:[%s1117_s8 + $0x38] sm:$0xff]   ;;  %v376_v33 = vld [vmem:[#allocation2 + $0x10] sm:$0xff]  ;;  %v374_v35 = vld [vmem:[#allocation2] sm:$0xff] }
  0x37   : > { %884 = vmatpush3.bf16.msra.mxu0 %v971_v18  ;;  %922 = vmatpush3.bf16.msra.mxu1 %v971_v18  ;;  %v384_v34 = vld [vmem:[#allocation2 + $0x50] sm:$0xff]  ;;  %v382_v36 = vld [vmem:[#allocation2 + $0x40] sm:$0xff]  ;;  %v377_v39 = vld [vmem:[#allocation2 + $0x18] sm:$0xff] }
  0x38   : > { %885 = vmatprep.subr.bf16.mxu0 %v972_v19  ;;  %915 = vmatprep.subr.bf16.mxu1 %v972_v19  ;;  %v385_v40 = vld [vmem:[#allocation2 + $0x58] sm:$0xff]  ;;  %v375_v45 = vld [vmem:[#allocation2 + $0x8] sm:$0xff]  ;;  %v380_v57 = vld [vmem:[#allocation2 + $0x30] sm:$0xff] }
  0x39   : > { %v383_v46 = vld [vmem:[#allocation2 + $0x48] sm:$0xff]  ;;  %v388_v58 = vld [vmem:[#allocation2 + $0x70] sm:$0xff]  ;;  %v378_v59 = vld [vmem:[#allocation2 + $0x20] sm:$0xff] }
  0x3a   : > { %v386_v60 = vld [vmem:[#allocation2 + $0x60] sm:$0xff]  ;;  %v381_v63 = vld [vmem:[#allocation2 + $0x38] sm:$0xff]  ;;  %v379_v5 = vld [vmem:[#allocation2 + $0x28] sm:$0xff] }
  0x3b   : > { %886 = vmatpush3.bf16.msra.mxu0 %v972_v19  ;;  %923 = vmatpush3.bf16.msra.mxu1 %v972_v19  ;;  %v389_v0 = vld [vmem:[#allocation2 + $0x78] sm:$0xff]  ;;  %v387_v6 = vld [vmem:[#allocation2 + $0x68] sm:$0xff]  ;;  %v860_v18 = vld [vmem:[%s1205_s2] ss:$0 sm:$0xff] (!%p859_p11) }
  0x3c   : > { %887 = vmatprep.subr.bf16.mxu0 %v973_v20  ;;  %916 = vmatprep.subr.bf16.mxu1 %v973_v20 }
  0x3f   : > { %888 = vmatpush3.bf16.msra.mxu0 %v973_v20  ;;  %924 = vmatpush3.bf16.msra.mxu1 %v973_v20 }
  0x40   : > { %889 = vmatprep.subr.bf16.mxu0 %v974_v23  ;;  %917 = vmatprep.subr.bf16.mxu1 %v974_v23 }
  0x43   : > { %890 = vmatpush3.bf16.msra.mxu0 %v974_v23  ;;  %925 = vmatpush3.bf16.msra.mxu1 %v974_v23 }
  0x44   : > { %891 = vmatprep.subr.bf16.mxu0 %v975_v24  ;;  %918 = vmatprep.subr.bf16.mxu1 %v975_v24 }
  0x47   : > { %892 = vmatpush3.bf16.msra.mxu0 %v975_v24  ;;  %926 = vmatpush3.bf16.msra.mxu1 %v975_v24 }
  0x48   : > { %893 = vmatprep.subr.bf16.mxu0 %v976_v25  ;;  %919 = vmatprep.subr.bf16.mxu1 %v976_v25 }
  0x4b   : > { %894 = vmatpush3.bf16.msra.mxu0 %v976_v25  ;;  %927 = vmatpush3.bf16.msra.mxu1 %v976_v25 }
  0x4c   : > { %895 = vmatprep.subr.bf16.mxu0 %v977_v26  ;;  %920 = vmatprep.subr.bf16.mxu1 %v977_v26 }
  0x4f   : > { %896 = vmatpush3.bf16.msra.mxu0 %v977_v26  ;;  %928 = vmatpush3.bf16.msra.mxu1 %v977_v26 }
  0x52   : > { %898 = vmatmul.mubr.bf16.vlgmr.msra.gmra.mrb[0].mxu0 %v980_v27  ;;  %906 = vmatmul.mubr.bf16.vlgmr.msra.gmra.mrb[0].mxu1 %v981_v28 }
  0x53   : > { %901 = vmatprep.mubr.bf16.mxu0 %v982_v29  ;;  %909 = vmatprep.mubr.bf16.mxu1 %v983_v30 }
  0x5a   : > { %902 = vmatmul.mubr.bf16.gmra.mrb[4].mxu0 %v984_v31  ;;  %910 = vmatmul.mubr.bf16.gmra.mrb[4].mxu1 %v985_v32 }
 0x125   : > { %v899_v37 = vpop.f32.mrb[0].mxu0  ;;  %v907_v38 = vpop.f32.mrb[0].mxu1 }
 0x126   : > { %v617_v41 = vadd.f32 %v899_v37, %v376_v33  ;;  %v625_v42 = vadd.f32 %v907_v38, %v384_v34  ;;  %v552_v43 = vpop.f32.mrb[1].mxu0  ;;  %v584_v44 = vpop.f32.mrb[1].mxu1 }
 0x127   : > { %v615_v47 = vadd.f32 %v552_v43, %v374_v35  ;;  %v623_v48 = vadd.f32 %v584_v44, %v382_v36  ;;  %v900_v49 = vpop.f32.mrb[2].mxu0  ;;  %v908_v50 = vpop.f32.mrb[2].mxu1 }
 0x128   : > { %633 = vst [vmem:[#allocation2 + $0x10] sm:$0xff] %v617_v41  ;;  %641 = vst [vmem:[#allocation2 + $0x50] sm:$0xff] %v625_v42  ;;  %v618_v51 = vadd.f32 %v900_v49, %v377_v39  ;;  %v626_v52 = vadd.f32 %v908_v50, %v385_v40  ;;  %v555_v53 = vpop.f32.mrb[3].mxu0  ;;  %v587_v54 = vpop.f32.mrb[3].mxu1 }
 0x129   : > { %631 = vst [vmem:[#allocation2] sm:$0xff] %v615_v47  ;;  %639 = vst [vmem:[#allocation2 + $0x40] sm:$0xff] %v623_v48  ;;  %v616_v55 = vadd.f32 %v555_v53, %v375_v45  ;;  %v624_v56 = vadd.f32 %v587_v54, %v383_v46 }
 0x12a   : > { %634 = vst [vmem:[#allocation2 + $0x18] sm:$0xff] %v618_v51  ;;  %642 = vst [vmem:[#allocation2 + $0x58] sm:$0xff] %v626_v52 }
 0x12b   : > { %632 = vst [vmem:[#allocation2 + $0x8] sm:$0xff] %v616_v55  ;;  %640 = vst [vmem:[#allocation2 + $0x48] sm:$0xff] %v624_v56 }
 0x12d   : > { %v903_v61 = vpop.f32.mrb[4].mxu0  ;;  %v911_v62 = vpop.f32.mrb[4].mxu1  ;;  %650 = sbr.rel (%p859_p11) target bundleno = 321 (0x141), region = 81 }
 0x12e   : > { %v621_v1 = vadd.f32 %v903_v61, %v380_v57  ;;  %v629_v2 = vadd.f32 %v911_v62, %v388_v58  ;;  %v568_v3 = vpop.f32.mrb[5].mxu0  ;;  %v600_v4 = vpop.f32.mrb[5].mxu1 }
 0x12f   : > { %v619_v7 = vadd.f32 %v568_v3, %v378_v59  ;;  %v627_v8 = vadd.f32 %v600_v4, %v386_v60  ;;  %v904_v9 = vpop.f32.mrb[6].mxu0  ;;  %v912_v10 = vpop.f32.mrb[6].mxu1  ;;  %v653_v22 = vld [vmem:[#allocation2 + $0x10] sm:$0xff] (!%p859_p11) }
 0x130   : > { %637 = vst [vmem:[#allocation2 + $0x30] sm:$0xff] %v621_v1  ;;  %645 = vst [vmem:[#allocation2 + $0x70] sm:$0xff] %v629_v2  ;;  %v622_v11 = vadd.f32 %v904_v9, %v381_v63  ;;  %v630_v12 = vadd.f32 %v912_v10, %v389_v0  ;;  %v571_v13 = vpop.f32.mrb[7].mxu0  ;;  %v603_v14 = vpop.f32.mrb[7].mxu1  ;;  %v651_v17 = vld [vmem:[#allocation2] sm:$0xff] (!%p859_p11)  ;;  %v676_v25 = vadd.f32 (!%p859_p11), %v860_v18, %v653_v22  ;;  %v661_v37 = vld [vmem:[#allocation2 + $0x50] sm:$0xff] (!%p859_p11) }
 0x131   : > { %635 = vst [vmem:[#allocation2 + $0x20] sm:$0xff] %v619_v7  ;;  %643 = vst [vmem:[#allocation2 + $0x60] sm:$0xff] %v627_v8  ;;  %v620_v15 = vadd.f32 %v571_v13, %v379_v5  ;;  %v628_v16 = vadd.f32 %v603_v14, %v387_v6  ;;  %v674_v20 = vadd.f32 (!%p859_p11), %v860_v18, %v651_v17  ;;  %v654_v23 = vld [vmem:[#allocation2 + $0x18] sm:$0xff] (!%p859_p11)  ;;  %v659_v35 = vld [vmem:[#allocation2 + $0x40] sm:$0xff] (!%p859_p11) }
 0x132   : > { %638 = vst [vmem:[#allocation2 + $0x38] sm:$0xff] %v622_v11  ;;  %646 = vst [vmem:[#allocation2 + $0x78] sm:$0xff] %v630_v12  ;;  %v652_v19 = vld [vmem:[#allocation2 + $0x8] sm:$0xff] (!%p859_p11)  ;;  %v677_v26 = vadd.f32 (!%p859_p11), %v860_v18, %v654_v23  ;;  %v692_v38 = vmax.f32 (!%p859_p11), %v676_v25, 0.0  ;;  %v662_v42 = vld [vmem:[#allocation2 + $0x58] sm:$0xff] (!%p859_p11)  ;;  %v682_v47 = vadd.f32 (!%p859_p11), %v860_v18, %v659_v35  ;;  %v684_v52 = vadd.f32 (!%p859_p11), %v860_v18, %v661_v37 }
 0x133   : > { %636 = vst [vmem:[#allocation2 + $0x28] sm:$0xff] %v620_v15  ;;  %644 = vst [vmem:[#allocation2 + $0x68] sm:$0xff] %v628_v16  ;;  %v675_v21 = vadd.f32 (!%p859_p11), %v860_v18, %v652_v19  ;;  %v690_v31 = vmax.f32 (!%p859_p11), %v674_v20, 0.0  ;;  %v660_v36 = vld [vmem:[#allocation2 + $0x48] sm:$0xff] (!%p859_p11)  ;;  %v685_v53 = vadd.f32 (!%p859_p11), %v860_v18, %v662_v42 }
 0x134   : > { %v693_v39 = vmax.f32 %v677_v26, 0.0  ;;  %v683_v48 = vadd.f32 %v860_v18, %v660_v36  ;;  %708 = vst [vmem:[%s1206_s3 + $0x10] sm:$0xff] %v692_v38  ;;  %v698_v55 = vmax.f32 %v682_v47, 0.0  ;;  %v700_v59 = vmax.f32 %v684_v52, 0.0 }
 0x135   : > { %v691_v32 = vmax.f32 %v675_v21, 0.0  ;;  %706 = vst [vmem:[%s1206_s3] sm:$0xff] %v690_v31  ;;  %v701_v60 = vmax.f32 %v685_v53, 0.0 }
 0x136   : > { %709 = vst [vmem:[%s1206_s3 + $0x18] sm:$0xff] %v693_v39  ;;  %v699_v56 = vmax.f32 %v683_v48, 0.0  ;;  %714 = vst [vmem:[%s1206_s3 + $0x40] sm:$0xff] %v698_v55 }
 0x137   : > { %v657_v29 = vld [vmem:[#allocation2 + $0x30] sm:$0xff]  ;;  %707 = vst [vmem:[%s1206_s3 + $0x8] sm:$0xff] %v691_v32  ;;  %716 = vst [vmem:[%s1206_s3 + $0x50] sm:$0xff] %v700_v59 }
 0x138   : > { %v655_v24 = vld [vmem:[#allocation2 + $0x20] sm:$0xff]  ;;  %v680_v34 = vadd.f32 %v860_v18, %v657_v29  ;;  %v665_v49 = vld [vmem:[#allocation2 + $0x70] sm:$0xff]  ;;  %715 = vst [vmem:[%s1206_s3 + $0x48] sm:$0xff] %v699_v56  ;;  %717 = vst [vmem:[%s1206_s3 + $0x58] sm:$0xff] %v701_v60 }
 0x139   : > { %v678_v27 = vadd.f32 %v860_v18, %v655_v24  ;;  %v658_v30 = vld [vmem:[#allocation2 + $0x38] sm:$0xff]  ;;  %v663_v43 = vld [vmem:[#allocation2 + $0x60] sm:$0xff]  ;;  %v688_v58 = vadd.f32 %v860_v18, %v665_v49 }
 0x13a   : > { %v656_v28 = vld [vmem:[#allocation2 + $0x28] sm:$0xff]  ;;  %v681_v41 = vadd.f32 %v860_v18, %v658_v30  ;;  %v696_v46 = vmax.f32 %v680_v34, 0.0  ;;  %v666_v50 = vld [vmem:[#allocation2 + $0x78] sm:$0xff]  ;;  %v686_v54 = vadd.f32 %v860_v18, %v663_v43 }
 0x13b   : > { %v679_v33 = vadd.f32 %v860_v18, %v656_v28  ;;  %v694_v40 = vmax.f32 %v678_v27, 0.0  ;;  %v664_v44 = vld [vmem:[#allocation2 + $0x68] sm:$0xff]  ;;  %v689_v62 = vadd.f32 %v860_v18, %v666_v50  ;;  %v704_v0 = vmax.f32 %v688_v58, 0.0 }
 0x13c   : > { %v697_v51 = vmax.f32 %v681_v41, 0.0  ;;  %712 = vst [vmem:[%s1206_s3 + $0x30] sm:$0xff] %v696_v46  ;;  %v687_v57 = vadd.f32 %v860_v18, %v664_v44  ;;  %v702_v61 = vmax.f32 %v686_v54, 0.0 }
 0x13d   : > { %v695_v45 = vmax.f32 %v679_v33, 0.0  ;;  %710 = vst [vmem:[%s1206_s3 + $0x20] sm:$0xff] %v694_v40  ;;  %v705_v1 = vmax.f32 %v689_v62, 0.0  ;;  %720 = vst [vmem:[%s1206_s3 + $0x70] sm:$0xff] %v704_v0 }
 0x13e   : > { %713 = vst [vmem:[%s1206_s3 + $0x38] sm:$0xff] %v697_v51  ;;  %v703_v63 = vmax.f32 %v687_v57, 0.0  ;;  %718 = vst [vmem:[%s1206_s3 + $0x60] sm:$0xff] %v702_v61 }
 0x13f   : > { %711 = vst [vmem:[%s1206_s3 + $0x28] sm:$0xff] %v695_v45  ;;  %721 = vst [vmem:[%s1206_s3 + $0x78] sm:$0xff] %v705_v1 }
 0x140   : > { %719 = vst [vmem:[%s1206_s3 + $0x68] sm:$0xff] %v703_v63 }
 0x141 PF: > { %s13_s16 = sadd.s32 1, %s1024_s16   ;;  %s1207_s12 = smov %s1012_s13 }
 0x142   : > { %p10_p12 = scmp.ge.s32.totalorder %s13_s16, 9   ;;  %s1208_s13 = smov %s1082_s20 }
 0x143   : > { %s1209_s14 = smov %s1020_s15  ;;  %s1210_s15 = smov %s1212_s17 }
 0x144   :  { %12 = sbr.rel (!%p10_p12) target bundleno = 3 (0x3), region = 122 }

// kernel: inception_b_forward.7
= control target key start
LH: loop header
LB: loop body
LE: loop exit
PB: predicated region body
PF: predicated region fallthrough
CT: control target
= control target key end

     0   :  { %s646_s0 = inlined_call_operand.vmem [shape: f32[9,104,128], index: 0, kind: input, shape index: {}]   ;;  %s647_s1 = inlined_call_operand.vmem [shape: f32[104,128], index: 1, kind: output, shape index: {}]  }
   0x1   :  { %v8_v0 = vld [vmem:[%s646_s0] sm:$0xff]  ;;  %v21_v1 = vld [vmem:[%s646_s0 + $0x68] sm:$0xff]  ;;  %v34_v2 = vld [vmem:[%s646_s0 + $0xd0] sm:$0xff] }
   0x2   :  { %v125_v3 = vmax.f32 %v8_v0, %v21_v1  ;;  %v47_v4 = vld [vmem:[%s646_s0 + $0x138] sm:$0xff]  ;;  %v9_v6 = vld [vmem:[%s646_s0 + $0x8] sm:$0xff]  ;;  %v22_v7 = vld [vmem:[%s646_s0 + $0x70] sm:$0xff] }
   0x3   :  { %v35_v8 = vld [vmem:[%s646_s0 + $0xd8] sm:$0xff]  ;;  %v60_v9 = vld [vmem:[%s646_s0 + $0x1a0] sm:$0xff]  ;;  %v133_v10 = vmax.f32 %v9_v6, %v22_v7  ;;  %v73_v11 = vld [vmem:[%s646_s0 + $0x208] sm:$0xff] }
   0x4   :  { %v126_v5 = vmax.f32 %v125_v3, %v34_v2  ;;  %v48_v13 = vld [vmem:[%s646_s0 + $0x140] sm:$0xff]  ;;  %v10_v15 = vld [vmem:[%s646_s0 + $0x10] sm:$0xff]  ;;  %v23_v16 = vld [vmem:[%s646_s0 + $0x78] sm:$0xff] }
   0x5   :  { %v134_v14 = vmax.f32 %v133_v10, %v35_v8  ;;  %v36_v17 = vld [vmem:[%s646_s0 + $0xe0] sm:$0xff]  ;;  %v61_v19 = vld [vmem:[%s646_s0 + $0x1a8] sm:$0xff]  ;;  %v141_v20 = vmax.f32 %v10_v15, %v23_v16  ;;  %v86_v21 = vld [vmem:[%s646_s0 + $0x270] sm:$0xff] }
   0x6   :  { %v127_v12 = vmax.f32 %v126_v5, %v47_v4  ;;  %v74_v22 = vld [vmem:[%s646_s0 + $0x210] sm:$0xff]  ;;  %v49_v24 = vld [vmem:[%s646_s0 + $0x148] sm:$0xff]  ;;  %v11_v27 = vld [vmem:[%s646_s0 + $0x18] sm:$0xff] }
   0x7   :  { %v135_v23 = vmax.f32 %v134_v14, %v48_v13  ;;  %v142_v26 = vmax.f32 %v141_v20, %v36_v17  ;;  %v24_v28 = vld [vmem:[%s646_s0 + $0x80] sm:$0xff]  ;;  %v37_v29 = vld [vmem:[%s646_s0 + $0xe8] sm:$0xff]  ;;  %v99_v30 = vld [vmem:[%s646_s0 + $0x2d8] sm:$0xff] }
   0x8   :  { %v128_v18 = vmax.f32 %v127_v12, %v60_v9  ;;  %v112_v31 = vld [vmem:[%s646_s0 + $0x340] sm:$0xff]  ;;  %v62_v33 = vld [vmem:[%s646_s0 + $0x1b0] sm:$0xff]  ;;  %v149_v34 = vmax.f32 %v11_v27, %v24_v28  ;;  %v87_v36 = vld [vmem:[%s646_s0 + $0x278] sm:$0xff] }
   0x9   :  { %v136_v32 = vmax.f32 %v135_v23, %v61_v19  ;;  %v75_v37 = vld [vmem:[%s646_s0 + $0x218] sm:$0xff]  ;;  %v143_v38 = vmax.f32 %v142_v26, %v49_v24  ;;  %v50_v39 = vld [vmem:[%s646_s0 + $0x150] sm:$0xff]  ;;  %v12_v42 = vld [vmem:[%s646_s0 + $0x20] sm:$0xff] }
   0xa   :  { %v129_v25 = vmax.f32 %v128_v18, %v73_v11  ;;  %v150_v41 = vmax.f32 %v149_v34, %v37_v29  ;;  %v25_v43 = vld [vmem:[%s646_s0 + $0x88] sm:$0xff]  ;;  %v38_v44 = vld [vmem:[%s646_s0 + $0xf0] sm:$0xff]  ;;  %v100_v46 = vld [vmem:[%s646_s0 + $0x2e0] sm:$0xff] }
   0xb   :  { %v137_v40 = vmax.f32 %v136_v32, %v74_v22  ;;  %v113_v47 = vld [vmem:[%s646_s0 + $0x348] sm:$0xff]  ;;  %v144_v48 = vmax.f32 %v143_v38, %v62_v33  ;;  %v63_v49 = vld [vmem:[%s646_s0 + $0x1b8] sm:$0xff]  ;;  %v157_v50 = vmax.f32 %v12_v42, %v25_v43  ;;  %v88_v52 = vld [vmem:[%s646_s0 + $0x280] sm:$0xff] }
   0xc   :  { %v130_v35 = vmax.f32 %v129_v25, %v86_v21  ;;  %v76_v53 = vld [vmem:[%s646_s0 + $0x220] sm:$0xff]  ;;  %v151_v54 = vmax.f32 %v150_v41, %v50_v39  ;;  %v51_v55 = vld [vmem:[%s646_s0 + $0x158] sm:$0xff]  ;;  %v13_v59 = vld [vmem:[%s646_s0 + $0x28] sm:$0xff] }
   0xd   :  { %v138_v51 = vmax.f32 %v137_v40, %v87_v36  ;;  %v145_v57 = vmax.f32 %v144_v48, %v75_v37  ;;  %v158_v58 = vmax.f32 %v157_v50, %v38_v44  ;;  %v26_v60 = vld [vmem:[%s646_s0 + $0x90] sm:$0xff]  ;;  %v39_v61 = vld [vmem:[%s646_s0 + $0xf8] sm:$0xff]  ;;  %v101_v63 = vld [vmem:[%s646_s0 + $0x2e8] sm:$0xff] }
   0xe   :  { %v131_v45 = vmax.f32 %v130_v35, %v99_v30  ;;  %v114_v0 = vld [vmem:[%s646_s0 + $0x350] sm:$0xff]  ;;  %v152_v1 = vmax.f32 %v151_v54, %v63_v49  ;;  %v64_v2 = vld [vmem:[%s646_s0 + $0x1c0] sm:$0xff]  ;;  %v165_v3 = vmax.f32 %v13_v59, %v26_v60  ;;  %v89_v5 = vld [vmem:[%s646_s0 + $0x288] sm:$0xff] }
   0xf   :  { %v139_v62 = vmax.f32 %v138_v51, %v100_v46  ;;  %v146_v4 = vmax.f32 %v145_v57, %v88_v52  ;;  %v77_v6 = vld [vmem:[%s646_s0 + $0x228] sm:$0xff]  ;;  %v159_v7 = vmax.f32 %v158_v58, %v51_v55  ;;  %v52_v8 = vld [vmem:[%s646_s0 + $0x160] sm:$0xff]  ;;  %v14_v12 = vld [vmem:[%s646_s0 + $0x30] sm:$0xff] }
  0x10   :  { %v132_v56 = vmax.f32 %v131_v45, %v112_v31  ;;  %v153_v10 = vmax.f32 %v152_v1, %v76_v53  ;;  %v166_v11 = vmax.f32 %v165_v3, %v39_v61  ;;  %v27_v13 = vld [vmem:[%s646_s0 + $0x98] sm:$0xff]  ;;  %v40_v14 = vld [vmem:[%s646_s0 + $0x100] sm:$0xff]  ;;  %v102_v16 = vld [vmem:[%s646_s0 + $0x2f0] sm:$0xff] }
  0x11   :  { %v140_v9 = vmax.f32 %v139_v62, %v113_v47  ;;  %v147_v15 = vmax.f32 %v146_v4, %v101_v63  ;;  %v115_v17 = vld [vmem:[%s646_s0 + $0x358] sm:$0xff]  ;;  %v160_v18 = vmax.f32 %v159_v7, %v64_v2  ;;  %v65_v19 = vld [vmem:[%s646_s0 + $0x1c8] sm:$0xff]  ;;  %v173_v20 = vmax.f32 %v14_v12, %v27_v13  ;;  %v90_v22 = vld [vmem:[%s646_s0 + $0x290] sm:$0xff] }
  0x12   :  { %229 = vst [vmem:[%s647_s1] sm:$0xff] %v132_v56  ;;  %v154_v21 = vmax.f32 %v153_v10, %v89_v5  ;;  %v78_v23 = vld [vmem:[%s646_s0 + $0x230] sm:$0xff]  ;;  %v167_v24 = vmax.f32 %v166_v11, %v52_v8  ;;  %v53_v25 = vld [vmem:[%s646_s0 + $0x168] sm:$0xff]  ;;  %v15_v29 = vld [vmem:[%s646_s0 + $0x38] sm:$0xff] }
  0x13   :  { %230 = vst [vmem:[%s647_s1 + $0x8] sm:$0xff] %v140_v9  ;;  %v148_v26 = vmax.f32 %v147_v15, %v114_v0  ;;  %v161_v27 = vmax.f32 %v160_v18, %v77_v6  ;;  %v174_v28 = vmax.f32 %v173_v20, %v40_v14  ;;  %v28_v30 = vld [vmem:[%s646_s0 + $0xa0] sm:$0xff]  ;;  %v41_v31 = vld [vmem:[%s646_s0 + $0x108] sm:$0xff]  ;;  %v103_v33 = vld [vmem:[%s646_s0 + $0x2f8] sm:$0xff] }
  0x14   :  { %v155_v32 = vmax.f32 %v154_v21, %v102_v16  ;;  %v116_v34 = vld [vmem:[%s646_s0 + $0x360] sm:$0xff]  ;;  %v168_v35 = vmax.f32 %v167_v24, %v65_v19  ;;  %v66_v36 = vld [vmem:[%s646_s0 + $0x1d0] sm:$0xff]  ;;  %v181_v37 = vmax.f32 %v15_v29, %v28_v30  ;;  %v91_v39 = vld [vmem:[%s646_s0 + $0x298] sm:$0xff] }
  0x15   :  { %231 = vst [vmem:[%s647_s1 + $0x10] sm:$0xff] %v148_v26  ;;  %v162_v38 = vmax.f32 %v161_v27, %v90_v22  ;;  %v79_v40 = vld [vmem:[%s646_s0 + $0x238] sm:$0xff]  ;;  %v175_v41 = vmax.f32 %v174_v28, %v53_v25  ;;  %v54_v42 = vld [vmem:[%s646_s0 + $0x170] sm:$0xff]  ;;  %v16_v46 = vld [vmem:[%s646_s0 + $0x40] sm:$0xff] }
  0x16   :  { %v156_v43 = vmax.f32 %v155_v32, %v115_v17  ;;  %v169_v44 = vmax.f32 %v168_v35, %v78_v23  ;;  %v182_v45 = vmax.f32 %v181_v37, %v41_v31  ;;  %v29_v47 = vld [vmem:[%s646_s0 + $0xa8] sm:$0xff]  ;;  %v42_v48 = vld [vmem:[%s646_s0 + $0x110] sm:$0xff]  ;;  %v104_v50 = vld [vmem:[%s646_s0 + $0x300] sm:$0xff] }
  0x17   :  { %v163_v49 = vmax.f32 %v162_v38, %v103_v33  ;;  %v117_v51 = vld [vmem:[%s646_s0 + $0x368] sm:$0xff]  ;;  %v176_v52 = vmax.f32 %v175_v41, %v66_v36  ;;  %v67_v53 = vld [vmem:[%s646_s0 + $0x1d8] sm:$0xff]  ;;  %v189_v54 = vmax.f32 %v16_v46, %v29_v47  ;;  %v92_v56 = vld [vmem:[%s646_s0 + $0x2a0] sm:$0xff] }
  0x18   :  { %232 = vst [vmem:[%s647_s1 + $0x18] sm:$0xff] %v156_v43  ;;  %v170_v55 = vmax.f32 %v169_v44, %v91_v39  ;;  %v80_v57 = vld [vmem:[%s646_s0 + $0x240] sm:$0xff]  ;;  %v183_v58 = vmax.f32 %v182_v45, %v54_v42  ;;  %v55_v59 = vld [vmem:[%s646_s0 + $0x178] sm:$0xff]  ;;  %v17_v63 = vld [vmem:[%s646_s0 + $0x48] sm:$0xff] }
  0x19   :  { %v164_v60 = vmax.f32 %v163_v49, %v116_v34  ;;  %v177_v61 = vmax.f32 %v176_v52, %v79_v40  ;;  %v190_v62 = vmax.f32 %v189_v54, %v42_v48  ;;  %v30_v0 = vld [vmem:[%s646_s0 + $0xb0] sm:$0xff]  ;;  %v43_v1 = vld [vmem:[%s646_s0 + $0x118] sm:$0xff]  ;;  %v105_v3 = vld [vmem:[%s646_s0 + $0x308] sm:$0xff] }
  0x1a   :  { %v171_v2 = vmax.f32 %v170_v55, %v104_v50  ;;  %v118_v4 = vld [vmem:[%s646_s0 + $0x370] sm:$0xff]  ;;  %v184_v5 = vmax.f32 %v183_v58, %v67_v53  ;;  %v68_v6 = vld [vmem:[%s646_s0 + $0x1e0] sm:$0xff]  ;;  %v197_v7 = vmax.f32 %v17_v63, %v30_v0  ;;  %v93_v9 = vld [vmem:[%s646_s0 + $0x2a8] sm:$0xff] }
  0x1b   :  { %233 = vst [vmem:[%s647_s1 + $0x20] sm:$0xff] %v164_v60  ;;  %v178_v8 = vmax.f32 %v177_v61, %v92_v56  ;;  %v81_v10 = vld [vmem:[%s646_s0 + $0x248] sm:$0xff]  ;;  %v191_v11 = vmax.f32 %v190_v62, %v55_v59  ;;  %v56_v12 = vld [vmem:[%s646_s0 + $0x180] sm:$0xff]  ;;  %v18_v16 = vld [vmem:[%s646_s0 + $0x50] sm:$0xff] }
  0x1c   :  { %v172_v13 = vmax.f32 %v171_v2, %v117_v51  ;;  %v185_v14 = vmax.f32 %v184_v5, %v80_v57  ;;  %v198_v15 = vmax.f32 %v197_v7, %v43_v1  ;;  %v31_v17 = vld [vmem:[%s646_s0 + $0xb8] sm:$0xff]  ;;  %v44_v18 = vld [vmem:[%s646_s0 + $0x120] sm:$0xff]  ;;  %v106_v20 = vld [vmem:[%s646_s0 + $0x310] sm:$0xff] }
  0x1d   :  { %v179_v19 = vmax.f32 %v178_v8, %v105_v3  ;;  %v119_v21 = vld [vmem:[%s646_s0 + $0x378] sm:$0xff]  ;;  %v192_v22 = vmax.f32 %v191_v11, %v68_v6  ;;  %v69_v23 = vld [vmem:[%s646_s0 + $0x1e8] sm:$0xff]  ;;  %v205_v24 = vmax.f32 %v18_v16, %v31_v17  ;;  %v94_v26 = vld [vmem:[%s646_s0 + $0x2b0] sm:$0xff] }
  0x1e   :  { %234 = vst [vmem:[%s647_s1 + $0x28] sm:$0xff] %v172_v13  ;;  %v186_v25 = vmax.f32 %v185_v14, %v93_v9  ;;  %v82_v27 = vld [vmem:[%s646_s0 + $0x250] sm:$0xff]  ;;  %v199_v28 = vmax.f32 %v198_v15, %v56_v12  ;;  %v57_v29 = vld [vmem:[%s646_s0 + $0x188] sm:$0xff]  ;;  %v19_v33 = vld [vmem:[%s646_s0 + $0x58] sm:$0xff] }
  0x1f   :  { %v180_v30 = vmax.f32 %v179_v19, %v118_v4  ;;  %v193_v31 = vmax.f32 %v192_v22, %v81_v10  ;;  %v206_v32 = vmax.f32 %v205_v24, %v44_v18  ;;  %v32_v34 = vld [vmem:[%s646_s0 + $0xc0] sm:$0xff]  ;;  %v45_v35 = vld [vmem:[%s646_s0 + $0x128] sm:$0xff]  ;;  %v107_v37 = vld [vmem:[%s646_s0 + $0x318] sm:$0xff] }
  0x20   :  { %v187_v36 = vmax.f32 %v186_v25, %v106_v20  ;;  %v120_v38 = vld [vmem:[%s646_s0 + $0x380] sm:$0xff]  ;;  %v200_v39 = vmax.f32 %v199_v28, %v69_v23  ;;  %v70_v40 = vld [vmem:[%s646_s0 + $0x1f0] sm:$0xff]  ;;  %v213_v41 = vmax.f32 %v19_v33, %v32_v34  ;;  %v95_v43 = vld [vmem:[%s646_s0 + $0x2b8] sm:$0xff] }
  0x21   :  { %235 = vst [vmem:[%s647_s1 + $0x30] sm:$0xff] %v180_v30  ;;  %v194_v42 = vmax.f32 %v193_v31, %v94_v26  ;;  %v83_v44 = vld [vmem:[%s646_s0 + $0x258] sm:$0xff]  ;;  %v207_v45 = vmax.f32 %v206_v32, %v57_v29  ;;  %v58_v46 = vld [vmem:[%s646_s0 + $0x190] sm:$0xff]  ;;  %v20_v50 = vld [vmem:[%s646_s0 + $0x60] sm:$0xff] }
  0x22   :  { %v188_v47 = vmax.f32 %v187_v36, %v119_v21  ;;  %v201_v48 = vmax.f32 %v200_v39, %v82_v27  ;;  %v214_v49 = vmax.f32 %v213_v41, %v45_v35  ;;  %v33_v51 = vld [vmem:[%s646_s0 + $0xc8] sm:$0xff]  ;;  %v46_v52 = vld [vmem:[%s646_s0 + $0x130] sm:$0xff]  ;;  %v108_v54 = vld [vmem:[%s646_s0 + $0x320] sm:$0xff] }
  0x23   :  { %v195_v53 = vmax.f32 %v194_v42, %v107_v37  ;;  %v208_v55 = vmax.f32 %v207_v45, %v70_v40  ;;  %v71_v56 = vld [vmem:[%s646_s0 + $0x1f8] sm:$0xff]  ;;  %v221_v57 = vmax.f32 %v20_v50, %v33_v51  ;;  %v96_v59 = vld [vmem:[%s646_s0 + $0x2c0] sm:$0xff]  ;;  %v121_v63 = vld [vmem:[%s646_s0 + $0x388] sm:$0xff] }
  0x24   :  { %236 = vst [vmem:[%s647_s1 + $0x38] sm:$0xff] %v188_v47  ;;  %v202_v58 = vmax.f32 %v201_v48, %v95_v43  ;;  %v215_v60 = vmax.f32 %v214_v49, %v58_v46  ;;  %v59_v61 = vld [vmem:[%s646_s0 + $0x198] sm:$0xff]  ;;  %v84_v1 = vld [vmem:[%s646_s0 + $0x260] sm:$0xff]  ;;  %v109_v4 = vld [vmem:[%s646_s0 + $0x328] sm:$0xff] }
  0x25   :  { %v196_v62 = vmax.f32 %v195_v53, %v120_v38  ;;  %v209_v0 = vmax.f32 %v208_v55, %v83_v44  ;;  %v222_v2 = vmax.f32 %v221_v57, %v46_v52  ;;  %v72_v6 = vld [vmem:[%s646_s0 + $0x200] sm:$0xff]  ;;  %v97_v8 = vld [vmem:[%s646_s0 + $0x2c8] sm:$0xff]  ;;  %v122_v11 = vld [vmem:[%s646_s0 + $0x390] sm:$0xff] }
  0x26   :  { %v203_v3 = vmax.f32 %v202_v58, %v108_v54  ;;  %v216_v5 = vmax.f32 %v215_v60, %v71_v56  ;;  %v85_v13 = vld [vmem:[%s646_s0 + $0x268] sm:$0xff]  ;;  %v110_v15 = vld [vmem:[%s646_s0 + $0x330] sm:$0xff]  ;;  %v123_v20 = vld [vmem:[%s646_s0 + $0x398] sm:$0xff] }
  0x27   :  { %237 = vst [vmem:[%s647_s1 + $0x40] sm:$0xff] %v196_v62  ;;  %v210_v7 = vmax.f32 %v209_v0, %v96_v59  ;;  %v223_v9 = vmax.f32 %v222_v2, %v59_v61  ;;  %v98_v18 = vld [vmem:[%s646_s0 + $0x2d0] sm:$0xff]  ;;  %v111_v23 = vld [vmem:[%s646_s0 + $0x338] sm:$0xff]  ;;  %v124_v26 = vld [vmem:[%s646_s0 + $0x3a0] sm:$0xff] }
  0x28   :  { %v204_v10 = vmax.f32 %v203_v3, %v121_v63  ;;  %v217_v12 = vmax.f32 %v216_v5, %v84_v1 }
  0x29   :  { %v211_v14 = vmax.f32 %v210_v7, %v109_v4  ;;  %v224_v16 = vmax.f32 %v223_v9, %v72_v6 }
  0x2a   :  { %238 = vst [vmem:[%s647_s1 + $0x48] sm:$0xff] %v204_v10  ;;  %v218_v17 = vmax.f32 %v217_v12, %v97_v8 }
  0x2b   :  { %v212_v19 = vmax.f32 %v211_v14, %v122_v11  ;;  %v225_v21 = vmax.f32 %v224_v16, %v85_v13 }
  0x2c   :  { %v219_v22 = vmax.f32 %v218_v17, %v110_v15 }
  0x2d   :  { %239 = vst [vmem:[%s647_s1 + $0x50] sm:$0xff] %v212_v19  ;;  %v226_v24 = vmax.f32 %v225_v21, %v98_v18 }
  0x2e   :  { %v220_v25 = vmax.f32 %v219_v22, %v123_v20 }
  0x2f   :  { %v227_v27 = vmax.f32 %v226_v24, %v111_v23 }
  0x30   :  { %240 = vst [vmem:[%s647_s1 + $0x58] sm:$0xff] %v220_v25 }
  0x31   :  { %v228_v28 = vmax.f32 %v227_v27, %v124_v26 }
  0x33   :  { %241 = vst [vmem:[%s647_s1 + $0x60] sm:$0xff] %v228_v28 }

// kernel: inception_b_forward.4
= control target key start
LH: loop header
LB: loop body
LE: loop exit
PB: predicated region body
PF: predicated region fallthrough
CT: control target
= control target key end

     0   :  { %v982_v1 = vmov 0   ;;  %v698_v33 = vlaneseq  ;;  %s1308_s1 = inlined_call_operand.vmem [shape: bf16[128,384], index: 1, kind: input, shape index: {}]   ;;  %s1309_s0 = inlined_call_operand.vmem [shape: bf16[128,128], index: 0, kind: input, shape index: {}]   ;;  %s1310_s2 = inlined_call_operand.vmem [shape: f32[1,384], index: 2, kind: input, shape index: {}]   ;;  %s1311_s3 = inlined_call_operand.vmem [shape: f32[128,384], index: 3, kind: output, shape index: {}]  }
   0x1   :  { %v942_v0 = vld [vmem:[%s1308_s1 + $0x4] ss:$12 sps:$4 sm:$0xff]   ;;  %371 = vmatprep.mubr.bf16.mxu0 %v982_v1  ;;  %v944_v2 = vld [vmem:[%s1308_s1] ss:$12 sps:$4 sm:$0xff]   ;;  %v945_v3 = vld [vmem:[%s1308_s1 + $0x1c] ss:$12 sps:$4 sm:$0xff]  }
   0x2   :  { %339 = vmatprep.subr.bf16.mxu0 %v942_v0  ;;  %v947_v4 = vld [vmem:[%s1308_s1 + $0x18] ss:$12 sps:$4 sm:$0xff]   ;;  %v948_v5 = vld [vmem:[%s1308_s1 + $0x34] ss:$12 sps:$4 sm:$0xff]   ;;  %v950_v6 = vld [vmem:[%s1308_s1 + $0x30] ss:$12 sps:$4 sm:$0xff]  }
   0x3   :  { %340 = vmatpush1.bf16.msra.mxu0 %v944_v2  ;;  %v951_v7 = vld [vmem:[%s1308_s1 + $0x4c] ss:$12 sps:$4 sm:$0xff]   ;;  %v953_v8 = vld [vmem:[%s1308_s1 + $0x48] ss:$12 sps:$4 sm:$0xff]   ;;  %v954_v9 = vld [vmem:[%s1308_s1 + $0x64] ss:$12 sps:$4 sm:$0xff]  }
   0x4   :  { %341 = vmatprep.subr.bf16.mxu0 %v945_v3  ;;  %v966_v10 = vld [vmem:[%s1308_s1 + $0x8] ss:$12 sps:$4 sm:$0xff]   ;;  %v967_v11 = vld [vmem:[%s1309_s0] sm:$0xff]   ;;  %v971_v17 = vld [vmem:[%s1308_s1 + $0x50] ss:$12 sps:$4 sm:$0xff]   ;;  %v699_v34 = vshrl.u32 %v698_v33, 7 }
   0x5   :  { %909 = vmatprep.subr.bf16.mxu1 %v966_v10  ;;  %v968_v12 = vld [vmem:[%s1308_s1 + $0x20] ss:$12 sps:$4 sm:$0xff]   ;;  %925 = vmatprep.mubr.bf16.mxu1 %v967_v11  ;;  %v969_v14 = vld [vmem:[%s1308_s1 + $0x38] ss:$12 sps:$4 sm:$0xff]   ;;  %v957_v15 = vld [vmem:[%s1308_s1 + $0x7c] ss:$12 sps:$4 sm:$0xff]  }
   0x6   :  { %v956_v13 = vld [vmem:[%s1308_s1 + $0x60] ss:$12 sps:$4 sm:$0xff]   ;;  %910 = vmatpush3.bf16.msra.mxu1 %v966_v10  ;;  %v959_v16 = vld [vmem:[%s1308_s1 + $0x78] ss:$12 sps:$4 sm:$0xff]   ;;  %v962_v19 = vld [vmem:[%s1308_s1 + $0x90] ss:$12 sps:$4 sm:$0xff]  }
   0x7   :  { %342 = vmatpush1.bf16.msra.mxu0 %v947_v4  ;;  %911 = vmatprep.subr.bf16.mxu1 %v968_v12  ;;  %v960_v18 = vld [vmem:[%s1308_s1 + $0x94] ss:$12 sps:$4 sm:$0xff]   ;;  %v963_v21 = vld [vmem:[%s1308_s1 + $0xac] ss:$12 sps:$4 sm:$0xff]   ;;  %v977_v25 = vld [vmem:[%s1308_s1 + $0xb0] ss:$12 sps:$4 sm:$0xff]  }
   0x8   :  { %343 = vmatprep.subr.bf16.mxu0 %v948_v5  ;;  %v972_v20 = vld [vmem:[%s1308_s1 + $0x68] ss:$12 sps:$4 sm:$0xff]   ;;  %v974_v23 = vld [vmem:[%s1308_s1 + $0x80] ss:$12 sps:$4 sm:$0xff]   ;;  %v975_v24 = vld [vmem:[%s1308_s1 + $0x98] ss:$12 sps:$4 sm:$0xff]  }
   0x9   :  { %v965_v22 = vld [vmem:[%s1308_s1 + $0xa8] ss:$12 sps:$4 sm:$0xff]   ;;  %v976_v28 = vld [vmem:[%s1309_s0 + $0x18] sm:$0xff]   ;;  %v978_v29 = vld [vmem:[%s1309_s0 + $0x20] sm:$0xff]   ;;  %v700_v35 = vsub.s32 0, %v699_v34  ;;  %v704_v37 = vsub.s32 1, %v699_v34 }
   0xa   :  { %912 = vmatpush3.bf16.msra.mxu1 %v968_v12  ;;  %v970_v26 = vld [vmem:[%s1309_s0 + $0x8] sm:$0xff]   ;;  %v973_v27 = vld [vmem:[%s1309_s0 + $0x10] sm:$0xff]   ;;  %v981_v32 = vld [vmem:[%s1309_s0 + $0x38] sm:$0xff]   ;;  %v708_v50 = vsub.s32 2, %v699_v34 }
   0xb   :  { %344 = vmatpush1.bf16.msra.mxu0 %v950_v6  ;;  %913 = vmatprep.subr.bf16.mxu1 %v969_v14  ;;  %v979_v30 = vld [vmem:[%s1309_s0 + $0x28] sm:$0xff]   ;;  %v980_v31 = vld [vmem:[%s1309_s0 + $0x30] sm:$0xff]   ;;  %v696_v36 = vld [vmem:[%s1310_s2] sm:$0x7] }
   0xc   :  { %345 = vmatprep.subr.bf16.mxu0 %v951_v7  ;;  %v1110_v38 = vrot.slane %v696_v36, %v700_v35  ;;  %v1112_v39 = vrot.slane %v696_v36, %v704_v37  ;;  %v1130_v54 = vrot.slane %v696_v36, %v708_v50 }
   0xe   :  { %914 = vmatpush3.bf16.msra.mxu1 %v969_v14 }
   0xf   :  { %346 = vmatpush1.bf16.msra.mxu0 %v953_v8  ;;  %915 = vmatprep.subr.bf16.mxu1 %v971_v17 }
  0x10   :  { %347 = vmatprep.subr.bf16.mxu0 %v954_v9 }
  0x12   :  { %916 = vmatpush3.bf16.msra.mxu1 %v971_v17 }
  0x13   :  { %348 = vmatpush1.bf16.msra.mxu0 %v956_v13  ;;  %917 = vmatprep.subr.bf16.mxu1 %v972_v20 }
  0x14   :  { %349 = vmatprep.subr.bf16.mxu0 %v957_v15 }
  0x16   :  { %918 = vmatpush3.bf16.msra.mxu1 %v972_v20 }
  0x17   :  { %350 = vmatpush1.bf16.msra.mxu0 %v959_v16  ;;  %919 = vmatprep.subr.bf16.mxu1 %v974_v23 }
  0x18   :  { %351 = vmatprep.subr.bf16.mxu0 %v960_v18 }
  0x1a   :  { %920 = vmatpush3.bf16.msra.mxu1 %v974_v23 }
  0x1b   :  { %352 = vmatpush1.bf16.msra.mxu0 %v962_v19  ;;  %921 = vmatprep.subr.bf16.mxu1 %v975_v24 }
  0x1c   :  { %353 = vmatprep.subr.bf16.mxu0 %v963_v21 }
  0x1e   :  { %922 = vmatpush3.bf16.msra.mxu1 %v975_v24 }
  0x1f   :  { %354 = vmatpush1.bf16.msra.mxu0 %v965_v22  ;;  %923 = vmatprep.subr.bf16.mxu1 %v977_v25 }
  0x22   :  { %372 = vmatmul.mubr.bf16.vlgmr.msra.gmra.mrb[0].mxu0 %v967_v11  ;;  %924 = vmatpush3.bf16.msra.mxu1 %v977_v25 }
  0x23   :  { %381 = vmatprep.mubr.bf16.mxu0 %v982_v1 }
  0x25   :  { %926 = vmatmul.mubr.bf16.vlgmr.msra.gmra.mrb[0].mxu1 %v970_v26 }
  0x26   :  { %929 = vmatprep.mubr.bf16.mxu1 %v973_v27 }
  0x2a   :  { %382 = vmatmul.mubr.bf16.gmra.mrb[4].mxu0 %v970_v26 }
  0x2b   :  { %391 = vmatprep.mubr.bf16.mxu0 %v982_v1 }
  0x2d   :  { %930 = vmatmul.mubr.bf16.gmra.mrb[4].mxu1 %v976_v28 }
  0x2e   :  { %933 = vmatprep.mubr.bf16.mxu1 %v978_v29 }
  0x32   :  { %392 = vmatmul.mubr.bf16.gmra.mrb[8].mxu0 %v973_v27 }
  0x33   :  { %401 = vmatprep.mubr.bf16.mxu0 %v982_v1 }
  0x35   :  { %934 = vmatmul.mubr.bf16.gmra.mrb[8].mxu1 %v979_v30 }
  0x36   :  { %937 = vmatprep.mubr.bf16.mxu1 %v980_v31 }
  0x3a   :  { %402 = vmatmul.mubr.bf16.gmra.mrb[12].mxu0 %v976_v28 }
  0x3b   :  { %411 = vmatprep.mubr.bf16.mxu0 %v982_v1 }
  0x3d   :  { %938 = vmatmul.mubr.bf16.gmra.mrb[12].mxu1 %v981_v32 }
  0x42   :  { %412 = vmatmul.mubr.bf16.gmra.mrb[16].mxu0 %v978_v29 }
  0x43   :  { %421 = vmatprep.mubr.bf16.mxu0 %v982_v1 }
  0x4a   :  { %422 = vmatmul.mubr.bf16.gmra.mrb[20].mxu0 %v979_v30 }
  0x4b   :  { %431 = vmatprep.mubr.bf16.mxu0 %v982_v1 }
  0x52   :  { %432 = vmatmul.mubr.bf16.gmra.mrb[24].mxu0 %v980_v31 }
  0x53   :  { %441 = vmatprep.mubr.bf16.mxu0 %v982_v1 }
  0x5a   :  { %442 = vmatmul.mubr.bf16.gmra.mrb[28].mxu0 %v981_v32 }
  0xf5   :  { %v373_v40 = vpop.f32.mrb[0].mxu0 }
  0xf6   :  { %v713_v41 = vadd.f32 %v1110_v38, %v373_v40  ;;  %v375_v42 = vpop.f32.mrb[1].mxu0 }
  0xf7   :  { %v714_v43 = vadd.f32 %v1112_v39, %v375_v42  ;;  %v377_v44 = vpop.f32.mrb[2].mxu0 }
  0xf8   :  { %v761_v45 = vmax.f32 %v713_v41, 0.0  ;;  %v716_v46 = vadd.f32 %v1110_v38, %v377_v44  ;;  %v379_v47 = vpop.f32.mrb[3].mxu0  ;;  %v927_v62 = vpop.f32.mrb[0].mxu1 }
  0xf9   :  { %v762_v48 = vmax.f32 %v714_v43, 0.0  ;;  %v717_v49 = vadd.f32 %v1112_v39, %v379_v47  ;;  %v721_v1 = vadd.f32 %v927_v62, %v1130_v54  ;;  %v486_v2 = vpop.f32.mrb[1].mxu1 }
  0xfa   :  { %809 = vst [vmem:[%s1311_s3] sm:$0xff] %v761_v45  ;;  %v764_v51 = vmax.f32 %v716_v46, 0.0  ;;  %v715_v4 = vadd.f32 %v1130_v54, %v486_v2  ;;  %v928_v5 = vpop.f32.mrb[2].mxu1 }
  0xfb   :  { %810 = vst [vmem:[%s1311_s3 + $0x8] sm:$0xff] %v762_v48  ;;  %v765_v52 = vmax.f32 %v717_v49, 0.0  ;;  %v769_v7 = vmax.f32 %v721_v1, 0.0  ;;  %v724_v8 = vadd.f32 %v928_v5, %v1130_v54  ;;  %v489_v9 = vpop.f32.mrb[3].mxu1 }
  0xfc   :  { %812 = vst [vmem:[%s1311_s3 + $0x18] sm:$0xff] %v764_v51  ;;  %v763_v10 = vmax.f32 %v715_v4, 0.0  ;;  %v718_v11 = vadd.f32 %v1130_v54, %v489_v9 }
  0xfd   :  { %813 = vst [vmem:[%s1311_s3 + $0x20] sm:$0xff] %v765_v52  ;;  %v383_v53 = vpop.f32.mrb[4].mxu0  ;;  %817 = vst [vmem:[%s1311_s3 + $0x40] sm:$0xff] %v769_v7  ;;  %v772_v13 = vmax.f32 %v724_v8, 0.0 }
  0xfe   :  { %v719_v55 = vadd.f32 %v1110_v38, %v383_v53  ;;  %v385_v56 = vpop.f32.mrb[5].mxu0  ;;  %811 = vst [vmem:[%s1311_s3 + $0x10] sm:$0xff] %v763_v10  ;;  %v766_v16 = vmax.f32 %v718_v11, 0.0 }
  0xff   :  { %v720_v57 = vadd.f32 %v1112_v39, %v385_v56  ;;  %v387_v58 = vpop.f32.mrb[6].mxu0  ;;  %820 = vst [vmem:[%s1311_s3 + $0x58] sm:$0xff] %v772_v13 }
 0x100   :  { %v767_v59 = vmax.f32 %v719_v55, 0.0  ;;  %v722_v60 = vadd.f32 %v1110_v38, %v387_v58  ;;  %v389_v61 = vpop.f32.mrb[7].mxu0  ;;  %814 = vst [vmem:[%s1311_s3 + $0x28] sm:$0xff] %v766_v16  ;;  %v931_v22 = vpop.f32.mrb[4].mxu1 }
 0x101   :  { %v768_v63 = vmax.f32 %v720_v57, 0.0  ;;  %v723_v0 = vadd.f32 %v1112_v39, %v389_v61  ;;  %v733_v25 = vadd.f32 %v931_v22, %v1130_v54  ;;  %v502_v26 = vpop.f32.mrb[5].mxu1 }
 0x102   :  { %815 = vst [vmem:[%s1311_s3 + $0x30] sm:$0xff] %v767_v59  ;;  %v770_v3 = vmax.f32 %v722_v60, 0.0  ;;  %v727_v28 = vadd.f32 %v1130_v54, %v502_v26  ;;  %v932_v29 = vpop.f32.mrb[6].mxu1 }
 0x103   :  { %816 = vst [vmem:[%s1311_s3 + $0x38] sm:$0xff] %v768_v63  ;;  %v771_v6 = vmax.f32 %v723_v0, 0.0  ;;  %v781_v31 = vmax.f32 %v733_v25, 0.0  ;;  %v736_v32 = vadd.f32 %v932_v29, %v1130_v54  ;;  %v505_v33 = vpop.f32.mrb[7].mxu1 }
 0x104   :  { %818 = vst [vmem:[%s1311_s3 + $0x48] sm:$0xff] %v770_v3  ;;  %v775_v34 = vmax.f32 %v727_v28, 0.0  ;;  %v730_v35 = vadd.f32 %v1130_v54, %v505_v33 }
 0x105   :  { %819 = vst [vmem:[%s1311_s3 + $0x50] sm:$0xff] %v771_v6  ;;  %v393_v12 = vpop.f32.mrb[8].mxu0  ;;  %829 = vst [vmem:[%s1311_s3 + $0xa0] sm:$0xff] %v781_v31  ;;  %v784_v37 = vmax.f32 %v736_v32, 0.0 }
 0x106   :  { %v725_v14 = vadd.f32 %v1110_v38, %v393_v12  ;;  %v395_v15 = vpop.f32.mrb[9].mxu0  ;;  %823 = vst [vmem:[%s1311_s3 + $0x70] sm:$0xff] %v775_v34  ;;  %v778_v42 = vmax.f32 %v730_v35, 0.0 }
 0x107   :  { %v726_v17 = vadd.f32 %v1112_v39, %v395_v15  ;;  %v397_v18 = vpop.f32.mrb[10].mxu0  ;;  %832 = vst [vmem:[%s1311_s3 + $0xb8] sm:$0xff] %v784_v37 }
 0x108   :  { %v773_v19 = vmax.f32 %v725_v14, 0.0  ;;  %v728_v20 = vadd.f32 %v1110_v38, %v397_v18  ;;  %v399_v21 = vpop.f32.mrb[11].mxu0  ;;  %826 = vst [vmem:[%s1311_s3 + $0x88] sm:$0xff] %v778_v42  ;;  %v935_v48 = vpop.f32.mrb[8].mxu1 }
 0x109   :  { %v774_v23 = vmax.f32 %v726_v17, 0.0  ;;  %v729_v24 = vadd.f32 %v1112_v39, %v399_v21  ;;  %v745_v51 = vadd.f32 %v935_v48, %v1130_v54  ;;  %v518_v52 = vpop.f32.mrb[9].mxu1 }
 0x10a   :  { %821 = vst [vmem:[%s1311_s3 + $0x60] sm:$0xff] %v773_v19  ;;  %v776_v27 = vmax.f32 %v728_v20, 0.0  ;;  %v739_v55 = vadd.f32 %v1130_v54, %v518_v52  ;;  %v936_v56 = vpop.f32.mrb[10].mxu1 }
 0x10b   :  { %822 = vst [vmem:[%s1311_s3 + $0x68] sm:$0xff] %v774_v23  ;;  %v777_v30 = vmax.f32 %v729_v24, 0.0  ;;  %v793_v58 = vmax.f32 %v745_v51, 0.0  ;;  %v748_v59 = vadd.f32 %v936_v56, %v1130_v54  ;;  %v521_v60 = vpop.f32.mrb[11].mxu1 }
 0x10c   :  { %824 = vst [vmem:[%s1311_s3 + $0x78] sm:$0xff] %v776_v27  ;;  %v787_v61 = vmax.f32 %v739_v55, 0.0  ;;  %v742_v62 = vadd.f32 %v1130_v54, %v521_v60 }
 0x10d   :  { %825 = vst [vmem:[%s1311_s3 + $0x80] sm:$0xff] %v777_v30  ;;  %v403_v36 = vpop.f32.mrb[12].mxu0  ;;  %841 = vst [vmem:[%s1311_s3 + $0x100] sm:$0xff] %v793_v58  ;;  %v796_v0 = vmax.f32 %v748_v59, 0.0 }
 0x10e   :  { %v731_v40 = vadd.f32 %v1110_v38, %v403_v36  ;;  %v405_v41 = vpop.f32.mrb[13].mxu0  ;;  %835 = vst [vmem:[%s1311_s3 + $0xd0] sm:$0xff] %v787_v61  ;;  %v790_v3 = vmax.f32 %v742_v62, 0.0 }
 0x10f   :  { %v732_v43 = vadd.f32 %v1112_v39, %v405_v41  ;;  %v407_v44 = vpop.f32.mrb[14].mxu0  ;;  %844 = vst [vmem:[%s1311_s3 + $0x118] sm:$0xff] %v796_v0 }
 0x110   :  { %v779_v45 = vmax.f32 %v731_v40, 0.0  ;;  %v734_v46 = vadd.f32 %v1110_v38, %v407_v44  ;;  %v409_v47 = vpop.f32.mrb[15].mxu0  ;;  %838 = vst [vmem:[%s1311_s3 + $0xe8] sm:$0xff] %v790_v3  ;;  %v939_v9 = vpop.f32.mrb[12].mxu1 }
 0x111   :  { %v780_v49 = vmax.f32 %v732_v43, 0.0  ;;  %v735_v50 = vadd.f32 %v1112_v39, %v409_v47  ;;  %v757_v12 = vadd.f32 %v939_v9, %v1130_v54  ;;  %v534_v13 = vpop.f32.mrb[13].mxu1 }
 0x112   :  { %827 = vst [vmem:[%s1311_s3 + $0x90] sm:$0xff] %v779_v45  ;;  %v782_v53 = vmax.f32 %v734_v46, 0.0  ;;  %v751_v15 = vadd.f32 %v1130_v54, %v534_v13  ;;  %v940_v16 = vpop.f32.mrb[14].mxu1 }
 0x113   :  { %828 = vst [vmem:[%s1311_s3 + $0x98] sm:$0xff] %v780_v49  ;;  %v783_v57 = vmax.f32 %v735_v50, 0.0  ;;  %v805_v18 = vmax.f32 %v757_v12, 0.0  ;;  %v760_v19 = vadd.f32 %v940_v16, %v1130_v54  ;;  %v537_v20 = vpop.f32.mrb[15].mxu1 }
 0x114   :  { %830 = vst [vmem:[%s1311_s3 + $0xa8] sm:$0xff] %v782_v53  ;;  %v799_v21 = vmax.f32 %v751_v15, 0.0  ;;  %v754_v22 = vadd.f32 %v1130_v54, %v537_v20 }
 0x115   :  { %831 = vst [vmem:[%s1311_s3 + $0xb0] sm:$0xff] %v783_v57  ;;  %v413_v63 = vpop.f32.mrb[16].mxu0  ;;  %853 = vst [vmem:[%s1311_s3 + $0x160] sm:$0xff] %v805_v18  ;;  %v808_v24 = vmax.f32 %v760_v19, 0.0 }
 0x116   :  { %v737_v1 = vadd.f32 %v1110_v38, %v413_v63  ;;  %v415_v2 = vpop.f32.mrb[17].mxu0  ;;  %847 = vst [vmem:[%s1311_s3 + $0x130] sm:$0xff] %v799_v21  ;;  %v802_v27 = vmax.f32 %v754_v22, 0.0 }
 0x117   :  { %v738_v4 = vadd.f32 %v1112_v39, %v415_v2  ;;  %v417_v5 = vpop.f32.mrb[18].mxu0  ;;  %856 = vst [vmem:[%s1311_s3 + $0x178] sm:$0xff] %v808_v24 }
 0x118   :  { %v785_v6 = vmax.f32 %v737_v1, 0.0  ;;  %v740_v7 = vadd.f32 %v1110_v38, %v417_v5  ;;  %v419_v8 = vpop.f32.mrb[19].mxu0  ;;  %850 = vst [vmem:[%s1311_s3 + $0x148] sm:$0xff] %v802_v27 }
 0x119   :  { %v786_v10 = vmax.f32 %v738_v4, 0.0  ;;  %v741_v11 = vadd.f32 %v1112_v39, %v419_v8 }
 0x11a   :  { %833 = vst [vmem:[%s1311_s3 + $0xc0] sm:$0xff] %v785_v6  ;;  %v788_v14 = vmax.f32 %v740_v7, 0.0 }
 0x11b   :  { %834 = vst [vmem:[%s1311_s3 + $0xc8] sm:$0xff] %v786_v10  ;;  %v789_v17 = vmax.f32 %v741_v11, 0.0 }
 0x11c   :  { %836 = vst [vmem:[%s1311_s3 + $0xd8] sm:$0xff] %v788_v14 }
 0x11d   :  { %837 = vst [vmem:[%s1311_s3 + $0xe0] sm:$0xff] %v789_v17  ;;  %v423_v23 = vpop.f32.mrb[20].mxu0 }
 0x11e   :  { %v743_v25 = vadd.f32 %v1110_v38, %v423_v23  ;;  %v425_v26 = vpop.f32.mrb[21].mxu0 }
 0x11f   :  { %v744_v54 = vadd.f32 %v1112_v39, %v425_v26  ;;  %v427_v28 = vpop.f32.mrb[22].mxu0 }
 0x120   :  { %v791_v29 = vmax.f32 %v743_v25, 0.0  ;;  %v746_v30 = vadd.f32 %v1110_v38, %v427_v28  ;;  %v429_v31 = vpop.f32.mrb[23].mxu0 }
 0x121   :  { %v792_v32 = vmax.f32 %v744_v54, 0.0  ;;  %v747_v33 = vadd.f32 %v1112_v39, %v429_v31 }
 0x122   :  { %839 = vst [vmem:[%s1311_s3 + $0xf0] sm:$0xff] %v791_v29  ;;  %v794_v34 = vmax.f32 %v746_v30, 0.0 }
 0x123   :  { %840 = vst [vmem:[%s1311_s3 + $0xf8] sm:$0xff] %v792_v32  ;;  %v795_v35 = vmax.f32 %v747_v33, 0.0 }
 0x124   :  { %842 = vst [vmem:[%s1311_s3 + $0x108] sm:$0xff] %v794_v34 }
 0x125   :  { %843 = vst [vmem:[%s1311_s3 + $0x110] sm:$0xff] %v795_v35  ;;  %v433_v36 = vpop.f32.mrb[24].mxu0 }
 0x126   :  { %v749_v37 = vadd.f32 %v1110_v38, %v433_v36  ;;  %v435_v40 = vpop.f32.mrb[25].mxu0 }
 0x127   :  { %v750_v41 = vadd.f32 %v1112_v39, %v435_v40  ;;  %v437_v42 = vpop.f32.mrb[26].mxu0 }
 0x128   :  { %v797_v43 = vmax.f32 %v749_v37, 0.0  ;;  %v752_v44 = vadd.f32 %v1110_v38, %v437_v42  ;;  %v439_v45 = vpop.f32.mrb[27].mxu0 }
 0x129   :  { %v798_v46 = vmax.f32 %v750_v41, 0.0  ;;  %v753_v47 = vadd.f32 %v1112_v39, %v439_v45 }
 0x12a   :  { %845 = vst [vmem:[%s1311_s3 + $0x120] sm:$0xff] %v797_v43  ;;  %v800_v48 = vmax.f32 %v752_v44, 0.0 }
 0x12b   :  { %846 = vst [vmem:[%s1311_s3 + $0x128] sm:$0xff] %v798_v46  ;;  %v801_v49 = vmax.f32 %v753_v47, 0.0 }
 0x12c   :  { %848 = vst [vmem:[%s1311_s3 + $0x138] sm:$0xff] %v800_v48 }
 0x12d   :  { %849 = vst [vmem:[%s1311_s3 + $0x140] sm:$0xff] %v801_v49  ;;  %v443_v50 = vpop.f32.mrb[28].mxu0 }
 0x12e   :  { %v755_v51 = vadd.f32 %v1110_v38, %v443_v50  ;;  %v445_v52 = vpop.f32.mrb[29].mxu0 }
 0x12f   :  { %v756_v53 = vadd.f32 %v1112_v39, %v445_v52  ;;  %v447_v55 = vpop.f32.mrb[30].mxu0 }
 0x130   :  { %v803_v56 = vmax.f32 %v755_v51, 0.0  ;;  %v758_v57 = vadd.f32 %v1110_v38, %v447_v55  ;;  %v449_v58 = vpop.f32.mrb[31].mxu0 }
 0x131   :  { %v804_v59 = vmax.f32 %v756_v53, 0.0  ;;  %v759_v60 = vadd.f32 %v1112_v39, %v449_v58 }
 0x132   :  { %851 = vst [vmem:[%s1311_s3 + $0x150] sm:$0xff] %v803_v56  ;;  %v806_v61 = vmax.f32 %v758_v57, 0.0 }
 0x133   :  { %852 = vst [vmem:[%s1311_s3 + $0x158] sm:$0xff] %v804_v59  ;;  %v807_v62 = vmax.f32 %v759_v60, 0.0 }
 0x134   :  { %854 = vst [vmem:[%s1311_s3 + $0x168] sm:$0xff] %v806_v61 }
 0x135   :  { %855 = vst [vmem:[%s1311_s3 + $0x170] sm:$0xff] %v807_v62 }

</bundles_post_ra>
